<compile_context>
chip_gen: v7x
topology: tpu7x:2x2x1
jax: 0.10.0
libtpu: 0.0.40
codegen_flags: <defaults>
</compile_context>

<pallas_src>
import jax
import jax.numpy as jnp
from jax import lax
from jax.experimental import pallas as pl
from jax.experimental.pallas import tpu as pltpu


# ----------------------------- config helpers -----------------------------

EXPAND_RATIO = 6.0
DEPTH_DIVISIBLE_BY = 8
MIN_DEPTH = 8
LAYER_NORM_EPS = 1e-3


def make_divisible(value, divisor=8, min_value=None):
    if min_value is None:
        min_value = divisor
    new_value = max(min_value, int(value + divisor / 2) // divisor * divisor)
    if new_value < 0.9 * value:
        new_value += divisor
    return int(new_value)


def fold_bn(gamma, beta, mean, var, eps):
    scale = gamma / jnp.sqrt(var + eps)
    bias = beta - mean * scale
    return scale, bias


def apply_tf_padding_nhwc(x, stride, kernel_size, dilation=1):
    """TF 'SAME' padding (matches apply_tf_padding, NHWC) -- reference only."""
    in_h, in_w = int(x.shape[1]), int(x.shape[2])
    pad_h = max(kernel_size - stride, 0) if in_h % stride == 0 \
        else max(kernel_size - in_h % stride, 0)
    pad_w = max(kernel_size - stride, 0) if in_w % stride == 0 \
        else max(kernel_size - in_w % stride, 0)
    pl_, pr = pad_w // 2, pad_w - pad_w // 2
    pt, pb = pad_h // 2, pad_h - pad_h // 2
    return jnp.pad(x, ((0, 0), (pt * dilation, pb * dilation),
                       (pl_ * dilation, pr * dilation), (0, 0)))


def _round_up(v, m):
    return (v + m - 1) // m * m


# ----------------------------- fused Pallas kernel --------------------------

def _make_fused_kernel(H, W, Wp, Cexp, use_residual):
    """One grid step = one full image.

    Refs (inputs in call order, then output):
      x    : (1, H, Wp, Cin)  NHWC input, W pre-padded (exact zeros) to Wp
      wexp : (Cin, Cexp)      expand_1x1 weight, BN scale folded, bf16
      bexp : (Wp, Cexp)       expand bias with TF-pad columns zeroed, f32
      wdw  : (9, Cexp)        depthwise 3x3 weight, BN scale folded, f32
      bdw  : (1, Cexp)        depthwise bias, f32
      wredt: (Cout, Cexp)     reduce_1x1 weight (transposed), BN folded, bf16
      bred : (Cout, 1)        reduce bias, f32
      res  : (1, Cin, H*W)    lane-dense NCHW residual (only if use_residual)
      o    : (1, Cout, H*W)   lane-dense NCHW output slab
    """
    def kernel(x_ref, wexp_ref, bexp_ref, wdw_ref, bdw_ref,
               wredt_ref, bred_ref, *rest):
        if use_residual:
            res_ref, o_ref = rest
        else:
            (o_ref,) = rest

        Cin = x_ref.shape[-1]

        # ---- expand_1x1 (BN scale folded), bf16 MXU operands, f32 acc -------
        xw = x_ref[0].reshape(H * Wp, Cin).astype(jnp.bfloat16)
        e_lin = jnp.dot(xw, wexp_ref[...],
                        preferred_element_type=jnp.float32)      # (H*Wp, Cexp)
        # Pad columns of the input are exact zeros and their bias entries are
        # zeroed in bexp, so the TF-"SAME" left/right pad ring stays exactly 0
        # through the bias add and ReLU6 -- no masking multiply needed.
        e = jnp.clip(e_lin.reshape(H, Wp, Cexp) + bexp_ref[...][None],
                     0.0, 6.0)                                    # (H, Wp, Cexp)
        # Top/bottom TF-"SAME" pad rows are explicit zero rows (also saves the
        # expand matmul + bias work on those 2 rows).
        zrow = jnp.zeros((1, Wp, Cexp), jnp.float32)
        e3 = jnp.concatenate([zrow, e, zrow], axis=0)             # (H+2, Wp, Cexp)

        # ---- depthwise 3x3 (BN scale folded) + bias + ReLU6 -----------------
        # 3 W-shifted views (sublane relayouts), each reused for 3 cheap H taps.
        # Accumulator starts as (first tap + bias): no zero splat, no extra add.
        wdw = wdw_ref[...]                                        # (9, Cexp)
        acc = None
        for kw in range(3):
            ew = e3[:, kw:kw + W, :]                              # (H+2, W, Cexp)
            for kh in range(3):
                tap = ew[kh:kh + H] * wdw[3 * kh + kw]
                acc = (tap + bdw_ref[...]) if acc is None else (acc + tap)
        y = jnp.clip(acc, 0.0, 6.0)                               # (H, W, Cexp)

        # ---- reduce_1x1 (BN scale folded) + bias, channel-major output ------
        # TODO(synk): for W not a multiple of 8 (real 28/14/7 stages) this
        # flatten crosses (8,128) tiles; use a batched dot_general there.
        y2d = y.reshape(H * W, Cexp).astype(jnp.bfloat16)
        z = lax.dot_general(wredt_ref[...], y2d,
                            dimension_numbers=(((1,), (1,)), ((), ())),
                            preferred_element_type=jnp.float32)   # (Cout, H*W)
        z = z + bred_ref[...]
        if use_residual:
            # exact f32 VPU add; residual arrives already lane-dense NCHW
            z = z + res_ref[0]
        o_ref[0] = z.astype(o_ref.dtype)

    return kernel


# -------------------------- module: forward pass ---------------------------

def mobilenetv2_inverted_residual(x_nchw, params, *, stride):
    """Fused Pallas forward of MobileNetV2InvertedResidual.
    Input/output: NCHW float32 (PyTorch convention)."""
    if stride != 1:
        # TODO(synk): stride=2 (downsampling, non-residual) depthwise path not implemented.
        raise NotImplementedError("stride=2 path not implemented")

    N, Cin, H, W = x_nchw.shape
    Cexp = params["w_exp"].shape[1]
    Cout = params["w_red"].shape[1]
    use_residual = (stride == 1) and (Cin == Cout)

    # Fold BatchNorm scales into the conv weights (trace-time, free).
    s1, b1 = fold_bn(params["bn1_g"], params["bn1_b"],
                     params["bn1_m"], params["bn1_v"], LAYER_NORM_EPS)
    s2, b2 = fold_bn(params["bn2_g"], params["bn2_b"],
                     params["bn2_m"], params["bn2_v"], LAYER_NORM_EPS)
    s3, b3 = fold_bn(params["bn3_g"], params["bn3_b"],
                     params["bn3_m"], params["bn3_v"], LAYER_NORM_EPS)
    w_exp_s = (params["w_exp"] * s1[None, :]).astype(jnp.bfloat16)   # (Cin, Cexp)
    w_dw_s = (params["w_dw"] * s2[None, None, :]).reshape(9, Cexp)   # f32 (VPU)
    w_red_t = jnp.transpose(params["w_red"] * s3[None, :]).astype(jnp.bfloat16)

    # Whole-image row tile (th == H): all real MobileNetV2 stages fit VMEM.
    # TODO(synk): if H*Wp*Cexp ever exceeds the VMEM budget, an H-split with a
    # 1-row halo would be needed; not required for MobileNetV2 shapes.
    Wp = _round_up(W + 2, 8)

    # Expand bias with the TF-"SAME" pad columns zeroed -> free column masking.
    wcol = jnp.arange(Wp)
    col_valid = ((wcol >= 1) & (wcol <= W)).astype(jnp.float32)[:, None]  # (Wp,1)
    b_exp_masked = col_valid * b1[None, :]                                 # (Wp,Cexp)

    # NHWC inside the kernel (channels on the 128-lane axis); W is pre-padded
    # with exact zeros for the depthwise halo and rounded up to 8 sublanes.
    x = jnp.transpose(x_nchw, (0, 2, 3, 1))
    x = jnp.pad(x, ((0, 0), (0, 0), (1, Wp - W - 1), (0, 0)))     # (N, H, Wp, Cin)

    args = [x, w_exp_s, b_exp_masked, w_dw_s, b2.reshape(1, Cexp),
            w_red_t, b3.reshape(Cout, 1)]
    in_specs = [
        pl.BlockSpec((1, H, Wp, Cin), lambda n: (n, 0, 0, 0)),
        # weights / biases: constant block index -> fetched once, stay resident
        pl.BlockSpec((Cin, Cexp), lambda n: (0, 0)),
        pl.BlockSpec((Wp, Cexp), lambda n: (0, 0)),
        pl.BlockSpec((9, Cexp), lambda n: (0, 0)),
        pl.BlockSpec((1, Cexp), lambda n: (0, 0)),
        pl.BlockSpec((Cout, Cexp), lambda n: (0, 0)),
        pl.BlockSpec((Cout, 1), lambda n: (0, 0)),
    ]
    if use_residual:
        # lane-dense NCHW view of the input for an exact f32 VPU residual add
        args.append(x_nchw.reshape(N, Cin, H * W))
        in_specs.append(pl.BlockSpec((1, Cin, H * W), lambda n: (n, 0, 0)))

    flops = 2 * N * H * W * (Cin * Cexp + 9 * Cexp + Cexp * Cout)
    bytes_accessed = (
        x.size * 4
        + (x_nchw.size * 4 if use_residual else 0)
        + w_exp_s.size * 2 + b_exp_masked.size * 4
        + w_dw_s.size * 4 + Cexp * 4
        + w_red_t.size * 2 + Cout * 4
        + N * Cout * H * W * 4)
    cost = pl.CostEstimate(flops=flops, transcendentals=0,
                           bytes_accessed=bytes_accessed)

    out3 = pl.pallas_call(
        _make_fused_kernel(H, W, Wp, Cexp, use_residual),
        out_shape=jax.ShapeDtypeStruct((N, Cout, H * W), x_nchw.dtype),
        grid=(N,),
        in_specs=in_specs,
        # channel-major (NCHW) lane-dense output: no XLA transpose needed
        out_specs=pl.BlockSpec((1, Cout, H * W), lambda n: (n, 0, 0)),
        compiler_params=pltpu.CompilerParams(
            dimension_semantics=("parallel",),
            vmem_limit_bytes=48 * 1024 * 1024),
        cost_estimate=cost,
    )(*args)
    return out3.reshape(N, Cout, H, W)


# -------------------------- pure-JAX reference ------------------------------

def reference_forward(x_nchw, params, *, stride):
    x = jnp.transpose(x_nchw, (0, 2, 3, 1))
    in_channels = x.shape[-1]
    out_channels = params["w_red"].shape[1]
    Cexp = params["w_exp"].shape[1]
    use_residual = (stride == 1) and (in_channels == out_channels)

    def bn(y, g, b, m, v):
        return (y - m) / jnp.sqrt(v + LAYER_NORM_EPS) * g + b

    y = jnp.einsum("nhwc,cd->nhwd", x, params["w_exp"])
    y = jnp.clip(bn(y, params["bn1_g"], params["bn1_b"],
                    params["bn1_m"], params["bn1_v"]), 0.0, 6.0)

    yp = apply_tf_padding_nhwc(y, stride, 3, 1)
    y = lax.conv_general_dilated(
        yp, params["w_dw"][:, :, None, :],
        window_strides=(stride, stride), padding="VALID",
        dimension_numbers=("NHWC", "HWIO", "NHWC"),
        feature_group_count=Cexp)
    y = jnp.clip(bn(y, params["bn2_g"], params["bn2_b"],
                    params["bn2_m"], params["bn2_v"]), 0.0, 6.0)

    z = jnp.einsum("nhwc,cd->nhwd", y, params["w_red"])
    z = bn(z, params["bn3_g"], params["bn3_b"], params["bn3_m"], params["bn3_v"])
    if use_residual:
        z = z + x
    return jnp.transpose(z, (0, 3, 1, 2))


# ----------------------------- param init ----------------------------------

def init_params(key, in_channels, out_channels):
    expanded = make_divisible(int(round(in_channels * EXPAND_RATIO)),
                              DEPTH_DIVISIBLE_BY, MIN_DEPTH)
    ks = jax.random.split(key, 15)

    def bn_params(k0, k1, k2, k3, c):
        return (jax.random.uniform(k0, (c,), jnp.float32, 0.8, 1.2),   # gamma
                0.05 * jax.random.normal(k1, (c,), jnp.float32),       # beta
                0.05 * jax.random.normal(k2, (c,), jnp.float32),       # mean
                jax.random.uniform(k3, (c,), jnp.float32, 0.5, 1.5))   # var

    g1, b1, m1, v1 = bn_params(ks[0], ks[1], ks[2], ks[3], expanded)
    g2, b2, m2, v2 = bn_params(ks[4], ks[5], ks[6], ks[7], expanded)
    g3, b3, m3, v3 = bn_params(ks[8], ks[9], ks[10], ks[11], out_channels)

    params = dict(
        # expand_1x1.convolution.weight (Cexp, Cin, 1, 1) stored as (Cin, Cexp)
        w_exp=0.1 * jax.random.normal(ks[12], (in_channels, expanded), jnp.float32),
        # conv_3x3 depthwise weight (Cexp, 1, 3, 3) stored as (3, 3, Cexp)
        w_dw=0.1 * jax.random.normal(ks[13], (3, 3, expanded), jnp.float32),
        # reduce_1x1.convolution.weight (Cout, Cexp, 1, 1) stored as (Cexp, Cout)
        w_red=0.1 * jax.random.normal(ks[14], (expanded, out_channels), jnp.float32),
        bn1_g=g1, bn1_b=b1, bn1_m=m1, bn1_v=v1,
        bn2_g=g2, bn2_b=b2, bn2_m=m2, bn2_v=v2,
        bn3_g=g3, bn3_b=b3, bn3_m=m3, bn3_v=v3,
    )
    return params, expanded


# --------------------------------- main -------------------------------------

if __name__ == "__main__":
    key = jax.random.PRNGKey(0)
    k_x, k_p1, k_p2 = jax.random.split(key, 3)

    N, C_IN, H, W, STRIDE = 2, 16, 16, 16, 1
    x = jax.random.normal(k_x, (N, C_IN, H, W), jnp.float32)   # NCHW

    # Tolerance: the f32 reference vs a bf16-MXU kernel (expand + reduce matmuls
    # use bf16 operands with f32 accumulation); the residual add is exact f32.
    RTOL = ATOL = 2e-2

    # --- residual configuration (in_channels == out_channels, stride=1) -----
    params_a, _ = init_params(k_p1, C_IN, C_IN)
    out_a = jax.block_until_ready(
        mobilenetv2_inverted_residual(x, params_a, stride=STRIDE))
    ref_a = jax.block_until_ready(reference_forward(x, params_a, stride=STRIDE))
    assert out_a.shape == (N, C_IN, H, W), out_a.shape
    err_a = float(jnp.max(jnp.abs(out_a - ref_a)))
    assert jnp.allclose(out_a, ref_a, rtol=RTOL, atol=ATOL), err_a

    # --- non-residual configuration (in_channels != out_channels) -----------
    C_OUT = 24
    params_b, _ = init_params(k_p2, C_IN, C_OUT)
    out_b = jax.block_until_ready(
        mobilenetv2_inverted_residual(x, params_b, stride=STRIDE))
    ref_b = jax.block_until_ready(reference_forward(x, params_b, stride=STRIDE))
    assert out_b.shape == (N, C_OUT, H, W), out_b.shape
    err_b = float(jnp.max(jnp.abs(out_b - ref_b)))
    assert jnp.allclose(out_b, ref_b, rtol=RTOL, atol=ATOL), err_b

    print("KERNEL_OK")
</pallas_src>

<mosaic_0001>
module attributes {stable_mosaic.version = 11 : i64} {
  func.func @kernel(%arg0: i32, %arg1: memref<1x16x24x16xf32, #tpu.memory_space<vmem>>, %arg2: memref<16x96xbf16, #tpu.memory_space<vmem>>, %arg3: memref<24x96xf32, #tpu.memory_space<vmem>>, %arg4: memref<9x96xf32, #tpu.memory_space<vmem>>, %arg5: memref<1x96xf32, #tpu.memory_space<vmem>>, %arg6: memref<16x96xbf16, #tpu.memory_space<vmem>>, %arg7: memref<16x1xf32, #tpu.memory_space<vmem>>, %arg8: memref<1x16x256xf32, #tpu.memory_space<vmem>>, %arg9: memref<1x16x256xf32, #tpu.memory_space<vmem>>) attributes {dimension_semantics = [#tpu.dimension_semantics<parallel>], iteration_bounds = array<i64: 2>, scalar_prefetch = 0 : i64, scratch_operands = 0 : i64, tpu.core_type = #tpu.core_type<tc>, window_params = [{transform_indices = @transform_0, window_bounds = array<i64: 1, 16, 24, 16>}, {pipeline_mode = #tpu.pipeline_mode<synchronous>, transform_indices = @transform_1, window_bounds = array<i64: 16, 96>}, {pipeline_mode = #tpu.pipeline_mode<synchronous>, transform_indices = @transform_2, window_bounds = array<i64: 24, 96>}, {pipeline_mode = #tpu.pipeline_mode<synchronous>, transform_indices = @transform_3, window_bounds = array<i64: 9, 96>}, {pipeline_mode = #tpu.pipeline_mode<synchronous>, transform_indices = @transform_4, window_bounds = array<i64: 1, 96>}, {pipeline_mode = #tpu.pipeline_mode<synchronous>, transform_indices = @transform_5, window_bounds = array<i64: 16, 96>}, {pipeline_mode = #tpu.pipeline_mode<synchronous>, transform_indices = @transform_6, window_bounds = array<i64: 16, 1>}, {transform_indices = @transform_7, window_bounds = array<i64: 1, 16, 256>}, {transform_indices = @transform_8, window_bounds = array<i64: 1, 16, 256>}]} {
    %c0 = arith.constant 0 : index
    %c0_0 = arith.constant 0 : index
    %c0_1 = arith.constant 0 : index
    %c0_2 = arith.constant 0 : index
    %0 = vector.load %arg1[%c0, %c0_0, %c0_1, %c0_2] : memref<1x16x24x16xf32, #tpu.memory_space<vmem>>, vector<1x16x24x16xf32>
    %1 = vector.shape_cast %0 : vector<1x16x24x16xf32> to vector<16x24x16xf32>
    %2 = vector.shape_cast %1 : vector<16x24x16xf32> to vector<384x16xf32>
    %3 = arith.truncf %2 : vector<384x16xf32> to vector<384x16xbf16>
    %c0_3 = arith.constant 0 : index
    %c0_4 = arith.constant 0 : index
    %4 = vector.load %arg2[%c0_3, %c0_4] : memref<16x96xbf16, #tpu.memory_space<vmem>>, vector<16x96xbf16>
    %cst = arith.constant dense<0.000000e+00> : vector<384x96xf32>
    %5 = tpu.matmul %3, %4, %cst {dimension_numbers = #tpu.dot_dimension_numbers<[1], [0], [0], [1], [0, 0, 1, 1], [], []>} : vector<384x16xbf16>, vector<16x96xbf16>, vector<384x96xf32> -> vector<384x96xf32>
    %6 = vector.shape_cast %5 : vector<384x96xf32> to vector<16x24x96xf32>
    %c0_5 = arith.constant 0 : index
    %c0_6 = arith.constant 0 : index
    %7 = vector.load %arg3[%c0_5, %c0_6] : memref<24x96xf32, #tpu.memory_space<vmem>>, vector<24x96xf32>
    %8 = vector.shape_cast %7 : vector<24x96xf32> to vector<1x24x96xf32>
    %9 = vector.broadcast %8 : vector<1x24x96xf32> to vector<16x24x96xf32>
    %10 = arith.addf %6, %9 : vector<16x24x96xf32>
    %cst_7 = arith.constant 0.000000e+00 : f32
    %cst_8 = arith.constant 6.000000e+00 : f32
    %11 = vector.broadcast %cst_7 : f32 to vector<16x24x96xf32>
    %12 = arith.maximumf %11, %10 : vector<16x24x96xf32>
    %13 = vector.broadcast %cst_8 : f32 to vector<16x24x96xf32>
    %14 = arith.minimumf %13, %12 : vector<16x24x96xf32>
    %cst_9 = arith.constant 0.000000e+00 : f32
    %15 = vector.broadcast %cst_9 : f32 to vector<1x24x96xf32>
    %16 = tpu.concatenate %15, %14, %15 in 0 : vector<1x24x96xf32>, vector<16x24x96xf32>, vector<1x24x96xf32> -> vector<18x24x96xf32>
    %c0_10 = arith.constant 0 : index
    %c0_11 = arith.constant 0 : index
    %17 = vector.load %arg4[%c0_10, %c0_11] : memref<9x96xf32, #tpu.memory_space<vmem>>, vector<9x96xf32>
    %18 = vector.extract_strided_slice %16 {offsets = [0, 0, 0], sizes = [18, 16, 96], strides = [1, 1, 1]} : vector<18x24x96xf32> to vector<18x16x96xf32>
    %19 = vector.extract_strided_slice %18 {offsets = [0, 0, 0], sizes = [16, 16, 96], strides = [1, 1, 1]} : vector<18x16x96xf32> to vector<16x16x96xf32>
    %20 = vector.extract_strided_slice %17 {offsets = [0, 0], sizes = [1, 96], strides = [1, 1]} : vector<9x96xf32> to vector<1x96xf32>
    %21 = vector.shape_cast %20 : vector<1x96xf32> to vector<96xf32>
    %22 = vector.shape_cast %21 : vector<96xf32> to vector<1x1x96xf32>
    %23 = vector.broadcast %22 : vector<1x1x96xf32> to vector<16x16x96xf32>
    %24 = arith.mulf %19, %23 : vector<16x16x96xf32>
    %c0_12 = arith.constant 0 : index
    %c0_13 = arith.constant 0 : index
    %25 = vector.load %arg5[%c0_12, %c0_13] : memref<1x96xf32, #tpu.memory_space<vmem>>, vector<1x96xf32>
    %26 = vector.shape_cast %25 : vector<1x96xf32> to vector<1x1x96xf32>
    %27 = vector.broadcast %26 : vector<1x1x96xf32> to vector<16x16x96xf32>
    %28 = arith.addf %24, %27 : vector<16x16x96xf32>
    %29 = vector.extract_strided_slice %18 {offsets = [1, 0, 0], sizes = [16, 16, 96], strides = [1, 1, 1]} : vector<18x16x96xf32> to vector<16x16x96xf32>
    %30 = vector.extract_strided_slice %17 {offsets = [3, 0], sizes = [1, 96], strides = [1, 1]} : vector<9x96xf32> to vector<1x96xf32>
    %31 = vector.shape_cast %30 : vector<1x96xf32> to vector<96xf32>
    %32 = vector.shape_cast %31 : vector<96xf32> to vector<1x1x96xf32>
    %33 = vector.broadcast %32 : vector<1x1x96xf32> to vector<16x16x96xf32>
    %34 = arith.mulf %29, %33 : vector<16x16x96xf32>
    %35 = arith.addf %28, %34 : vector<16x16x96xf32>
    %36 = vector.extract_strided_slice %18 {offsets = [2, 0, 0], sizes = [16, 16, 96], strides = [1, 1, 1]} : vector<18x16x96xf32> to vector<16x16x96xf32>
    %37 = vector.extract_strided_slice %17 {offsets = [6, 0], sizes = [1, 96], strides = [1, 1]} : vector<9x96xf32> to vector<1x96xf32>
    %38 = vector.shape_cast %37 : vector<1x96xf32> to vector<96xf32>
    %39 = vector.shape_cast %38 : vector<96xf32> to vector<1x1x96xf32>
    %40 = vector.broadcast %39 : vector<1x1x96xf32> to vector<16x16x96xf32>
    %41 = arith.mulf %36, %40 : vector<16x16x96xf32>
    %42 = arith.addf %35, %41 : vector<16x16x96xf32>
    %43 = vector.extract_strided_slice %16 {offsets = [0, 1, 0], sizes = [18, 16, 96], strides = [1, 1, 1]} : vector<18x24x96xf32> to vector<18x16x96xf32>
    %44 = vector.extract_strided_slice %43 {offsets = [0, 0, 0], sizes = [16, 16, 96], strides = [1, 1, 1]} : vector<18x16x96xf32> to vector<16x16x96xf32>
    %45 = vector.extract_strided_slice %17 {offsets = [1, 0], sizes = [1, 96], strides = [1, 1]} : vector<9x96xf32> to vector<1x96xf32>
    %46 = vector.shape_cast %45 : vector<1x96xf32> to vector<96xf32>
    %47 = vector.shape_cast %46 : vector<96xf32> to vector<1x1x96xf32>
    %48 = vector.broadcast %47 : vector<1x1x96xf32> to vector<16x16x96xf32>
    %49 = arith.mulf %44, %48 : vector<16x16x96xf32>
    %50 = arith.addf %42, %49 : vector<16x16x96xf32>
    %51 = vector.extract_strided_slice %43 {offsets = [1, 0, 0], sizes = [16, 16, 96], strides = [1, 1, 1]} : vector<18x16x96xf32> to vector<16x16x96xf32>
    %52 = vector.extract_strided_slice %17 {offsets = [4, 0], sizes = [1, 96], strides = [1, 1]} : vector<9x96xf32> to vector<1x96xf32>
    %53 = vector.shape_cast %52 : vector<1x96xf32> to vector<96xf32>
    %54 = vector.shape_cast %53 : vector<96xf32> to vector<1x1x96xf32>
    %55 = vector.broadcast %54 : vector<1x1x96xf32> to vector<16x16x96xf32>
    %56 = arith.mulf %51, %55 : vector<16x16x96xf32>
    %57 = arith.addf %50, %56 : vector<16x16x96xf32>
    %58 = vector.extract_strided_slice %43 {offsets = [2, 0, 0], sizes = [16, 16, 96], strides = [1, 1, 1]} : vector<18x16x96xf32> to vector<16x16x96xf32>
    %59 = vector.extract_strided_slice %17 {offsets = [7, 0], sizes = [1, 96], strides = [1, 1]} : vector<9x96xf32> to vector<1x96xf32>
    %60 = vector.shape_cast %59 : vector<1x96xf32> to vector<96xf32>
    %61 = vector.shape_cast %60 : vector<96xf32> to vector<1x1x96xf32>
    %62 = vector.broadcast %61 : vector<1x1x96xf32> to vector<16x16x96xf32>
    %63 = arith.mulf %58, %62 : vector<16x16x96xf32>
    %64 = arith.addf %57, %63 : vector<16x16x96xf32>
    %65 = vector.extract_strided_slice %16 {offsets = [0, 2, 0], sizes = [18, 16, 96], strides = [1, 1, 1]} : vector<18x24x96xf32> to vector<18x16x96xf32>
    %66 = vector.extract_strided_slice %65 {offsets = [0, 0, 0], sizes = [16, 16, 96], strides = [1, 1, 1]} : vector<18x16x96xf32> to vector<16x16x96xf32>
    %67 = vector.extract_strided_slice %17 {offsets = [2, 0], sizes = [1, 96], strides = [1, 1]} : vector<9x96xf32> to vector<1x96xf32>
    %68 = vector.shape_cast %67 : vector<1x96xf32> to vector<96xf32>
    %69 = vector.shape_cast %68 : vector<96xf32> to vector<1x1x96xf32>
    %70 = vector.broadcast %69 : vector<1x1x96xf32> to vector<16x16x96xf32>
    %71 = arith.mulf %66, %70 : vector<16x16x96xf32>
    %72 = arith.addf %64, %71 : vector<16x16x96xf32>
    %73 = vector.extract_strided_slice %65 {offsets = [1, 0, 0], sizes = [16, 16, 96], strides = [1, 1, 1]} : vector<18x16x96xf32> to vector<16x16x96xf32>
    %74 = vector.extract_strided_slice %17 {offsets = [5, 0], sizes = [1, 96], strides = [1, 1]} : vector<9x96xf32> to vector<1x96xf32>
    %75 = vector.shape_cast %74 : vector<1x96xf32> to vector<96xf32>
    %76 = vector.shape_cast %75 : vector<96xf32> to vector<1x1x96xf32>
    %77 = vector.broadcast %76 : vector<1x1x96xf32> to vector<16x16x96xf32>
    %78 = arith.mulf %73, %77 : vector<16x16x96xf32>
    %79 = arith.addf %72, %78 : vector<16x16x96xf32>
    %80 = vector.extract_strided_slice %65 {offsets = [2, 0, 0], sizes = [16, 16, 96], strides = [1, 1, 1]} : vector<18x16x96xf32> to vector<16x16x96xf32>
    %81 = vector.extract_strided_slice %17 {offsets = [8, 0], sizes = [1, 96], strides = [1, 1]} : vector<9x96xf32> to vector<1x96xf32>
    %82 = vector.shape_cast %81 : vector<1x96xf32> to vector<96xf32>
    %83 = vector.shape_cast %82 : vector<96xf32> to vector<1x1x96xf32>
    %84 = vector.broadcast %83 : vector<1x1x96xf32> to vector<16x16x96xf32>
    %85 = arith.mulf %80, %84 : vector<16x16x96xf32>
    %86 = arith.addf %79, %85 : vector<16x16x96xf32>
    %cst_14 = arith.constant 0.000000e+00 : f32
    %cst_15 = arith.constant 6.000000e+00 : f32
    %87 = vector.broadcast %cst_14 : f32 to vector<16x16x96xf32>
    %88 = arith.maximumf %87, %86 : vector<16x16x96xf32>
    %89 = vector.broadcast %cst_15 : f32 to vector<16x16x96xf32>
    %90 = arith.minimumf %89, %88 : vector<16x16x96xf32>
    %91 = vector.shape_cast %90 : vector<16x16x96xf32> to vector<256x96xf32>
    %92 = arith.truncf %91 : vector<256x96xf32> to vector<256x96xbf16>
    %c0_16 = arith.constant 0 : index
    %c0_17 = arith.constant 0 : index
    %93 = vector.load %arg6[%c0_16, %c0_17] : memref<16x96xbf16, #tpu.memory_space<vmem>>, vector<16x96xbf16>
    %cst_18 = arith.constant dense<0.000000e+00> : vector<16x256xf32>
    %94 = tpu.matmul %93, %92, %cst_18 {dimension_numbers = #tpu.dot_dimension_numbers<[1], [1], [0], [0], [0, 0, 1, 0], [], []>} : vector<16x96xbf16>, vector<256x96xbf16>, vector<16x256xf32> -> vector<16x256xf32>
    %c0_19 = arith.constant 0 : index
    %c0_20 = arith.constant 0 : index
    %95 = vector.load %arg7[%c0_19, %c0_20] : memref<16x1xf32, #tpu.memory_space<vmem>>, vector<16x1xf32>
    %96 = vector.broadcast %95 : vector<16x1xf32> to vector<16x256xf32>
    %97 = arith.addf %94, %96 : vector<16x256xf32>
    %c0_21 = arith.constant 0 : index
    %c0_22 = arith.constant 0 : index
    %c0_23 = arith.constant 0 : index
    %98 = vector.load %arg8[%c0_21, %c0_22, %c0_23] : memref<1x16x256xf32, #tpu.memory_space<vmem>>, vector<1x16x256xf32>
    %99 = vector.shape_cast %98 : vector<1x16x256xf32> to vector<16x256xf32>
    %100 = arith.addf %97, %99 : vector<16x256xf32>
    %c0_24 = arith.constant 0 : index
    %c0_25 = arith.constant 0 : index
    %c0_26 = arith.constant 0 : index
    %101 = vector.load %arg9[%c0_24, %c0_25, %c0_26] : memref<1x16x256xf32, #tpu.memory_space<vmem>>, vector<1x16x256xf32>
    %102 = vector.shape_cast %101 : vector<1x16x256xf32> to vector<16x256xf32>
    %103 = vector.shape_cast %100 : vector<16x256xf32> to vector<1x16x256xf32>
    tpu.vector_store %arg9[%c0_24, %c0_25, %c0_26], %103 {strides = array<i32>} : memref<1x16x256xf32, #tpu.memory_space<vmem>>, vector<1x16x256xf32>,
    return
  }
  func.func @transform_0(%arg0: i32) -> (i32, i32, i32, i32) {
    %c0_i32 = arith.constant 0 : i32
    %c0_i32_0 = arith.constant 0 : i32
    %c0_i32_1 = arith.constant 0 : i32
    %c0_i32_2 = arith.constant 0 : i32
    return %arg0, %c0_i32, %c0_i32_0, %c0_i32_1 : i32, i32, i32, i32
  }
  func.func @transform_1(%arg0: i32) -> (i32, i32) {
    %c0_i32 = arith.constant 0 : i32
    %c0_i32_0 = arith.constant 0 : i32
    %c0_i32_1 = arith.constant 0 : i32
    return %c0_i32, %c0_i32_0 : i32, i32
  }
  func.func @transform_2(%arg0: i32) -> (i32, i32) {
    %c0_i32 = arith.constant 0 : i32
    %c0_i32_0 = arith.constant 0 : i32
    %c0_i32_1 = arith.constant 0 : i32
    return %c0_i32, %c0_i32_0 : i32, i32
  }
  func.func @transform_3(%arg0: i32) -> (i32, i32) {
    %c0_i32 = arith.constant 0 : i32
    %c0_i32_0 = arith.constant 0 : i32
    %c0_i32_1 = arith.constant 0 : i32
    return %c0_i32, %c0_i32_0 : i32, i32
  }
  func.func @transform_4(%arg0: i32) -> (i32, i32) {
    %c0_i32 = arith.constant 0 : i32
    %c0_i32_0 = arith.constant 0 : i32
    %c0_i32_1 = arith.constant 0 : i32
    return %c0_i32, %c0_i32_0 : i32, i32
  }
  func.func @transform_5(%arg0: i32) -> (i32, i32) {
    %c0_i32 = arith.constant 0 : i32
    %c0_i32_0 = arith.constant 0 : i32
    %c0_i32_1 = arith.constant 0 : i32
    return %c0_i32, %c0_i32_0 : i32, i32
  }
  func.func @transform_6(%arg0: i32) -> (i32, i32) {
    %c0_i32 = arith.constant 0 : i32
    %c0_i32_0 = arith.constant 0 : i32
    %c0_i32_1 = arith.constant 0 : i32
    return %c0_i32, %c0_i32_0 : i32, i32
  }
  func.func @transform_7(%arg0: i32) -> (i32, i32, i32) {
    %c0_i32 = arith.constant 0 : i32
    %c0_i32_0 = arith.constant 0 : i32
    %c0_i32_1 = arith.constant 0 : i32
    return %arg0, %c0_i32, %c0_i32_0 : i32, i32, i32
  }
  func.func @transform_8(%arg0: i32) -> (i32, i32, i32) {
    %c0_i32 = arith.constant 0 : i32
    %c0_i32_0 = arith.constant 0 : i32
    %c0_i32_1 = arith.constant 0 : i32
    return %arg0, %c0_i32, %c0_i32_0 : i32, i32, i32
  }
}

</mosaic_0001>

<bundles_post_ra>
// kernel: tpu_custom_call.1
= control target key start
LH: loop header
LB: loop body
LE: loop exit
PB: predicated region body
PF: predicated region fallthrough
CT: control target
= control target key end

     0   :  { %13 = vsyncpa [#allocation3], 0  ;;  %s4785_s0 = inlined_call_operand.vmem [shape: f32[2,16,24,16], index: 0, kind: input, shape index: {}]   ;;  %s4786_s1 = inlined_call_operand.vmem [shape: bf16[16,96], index: 1, kind: input, shape index: {}]   ;;  %s4787_s2 = inlined_call_operand.vmem [shape: f32[24,96], index: 2, kind: input, shape index: {}]   ;;  %s4788_s3 = inlined_call_operand.vmem [shape: f32[9,96], index: 3, kind: input, shape index: {}]   ;;  %s4789_s4 = inlined_call_operand.vmem [shape: f32[1,96], index: 4, kind: input, shape index: {}]   ;;  %s4790_s5 = inlined_call_operand.vmem [shape: bf16[16,96], index: 5, kind: input, shape index: {}]   ;;  %s4791_s6 = inlined_call_operand.vmem [shape: f32[16,1], index: 6, kind: input, shape index: {}]   ;;  %s4792_s7 = inlined_call_operand.vmem [shape: f32[2,16,256], index: 7, kind: input, shape index: {}]   ;;  %s4793_s8 = inlined_call_operand.hbm [shape: f32[2,16,256], index: 8, kind: output, shape index: {}]  }
   0x1   :  { %15 = vsyncpa [#allocation3 + $0x1], 0  ;;  %s3096_s27 = smov 0   ;;  %s3098_s28 = smov 0  }
   0x2   :  { %s3100_s29 = smov 0   ;;  %s3102_s30 = smov 0  }
   0x3 LB: > { %s3117_s9 = sadd.s32 4294967295, %s3045_s30   ;;  %s2788_s10 = sadd.s32 4294967294, %s3045_s30   ;;  %s3045_s30 = sphi %s3102_s30, %s5060_s30   ;;  %s3041_s29 = sphi %s3100_s29, %s5059_s29   ;;  %s3037_s28 = sphi %s3098_s28, %s5058_s28   ;;  %s3033_s27 = sphi %s3096_s27, %s5057_s27  }
   0x4   : > { %s3121_s11 = sadd.s32 1, %s3045_s30   ;;  %s206_s12 = sadd.s32 1, %s3041_s29 }
   0x5   : > { %s203_s13 = ssub.s32 %s3045_s30, %s3121_s11  ;;  %p216_p0 = scmp.ne.s32.totalorder %s3041_s29, %s3037_s28 }
   0x6   : > { %p204_p1 = scmp.eq.s32.totalorder %s203_s13, 0  ;;  %p217_p2 = scmp.eq.s32.totalorder %s3117_s9, 1 }
   0x7   : > { %p222_p3 = scmp.ne.s32.totalorder %s3037_s28, %s3033_s27  ;;  %p223_p4 = scmp.eq.s32.totalorder %s2788_s10, 1 }
   0x8   : > { %s3132_s14 = scalar_select %p204_p1, %s3041_s29, %s206_s12  }
   0x9   : > { %p3134_p5 = por %p217_p2, %p216_p0  ;;  %p3138_p6 = por %p223_p4, %p222_p3 }
   0xa   : > { %p2791_p7 = scmp.ge.s32.totalorder %s3045_s30, 1  ;;  %p275_p8 = scmp.lt.s32.totalorder %s3045_s30, 3 }
   0xc   : > { %p276_p9 = pnand %p2791_p7, %p275_p8 }
   0xe   : > { %279 = sbr.rel (%p276_p9) target bundleno = 843 (0x34b), region = 52 }
  0x15   : > { %v2977_v0 = vld [vmem:[%s4786_s1] sm:$0xff]   ;;  %p314_p10 = scmp.lt.s32.totalorder %s3117_s9, 1  ;;  %vm405_vm0 = vcmask 130048   ;;  %vm1156_vm1 = vcmask 1046528   ;;  %vm1873_vm2 = vcmask 1045504   ;;  %vm2593_vm3 = vcmask 785408  }
  0x16   : > { %2875 = vmatprep.subr.bf16.mxu0 %v2977_v0  ;;  %s311_s10 = sand.u32 1, %s3037_s28  }
  0x17   : > { %s3149_s19 = scalar_select %p314_p10, %s3117_s9, 1  ;;  %2876 = vmatpush3.bf16.msra.mxu0 %v2977_v0 }
  0x18   : > { %s2792_s18 = sshll.u32 %s311_s10, 5 }
  0x19   : > { %s2933_s20 = smul.u32 384, %s3149_s19  ;;  %s2830_s26 = sshll.u32 %s3149_s19, 5 }
  0x1a   : > { %s323_s17 = scalar_lea.vmem %s4792_s7, %s2830_s26  ;;  %s2831_s19 = sshll.u32 %s3117_s9, 9 }
  0x1b   : > { %s3155_s23 = scalar_lea.vmem %s4785_s0, %s2933_s20  ;;  %s313_s20 = scalar_lea.vmem [#allocation2], %s2792_s18 }
  0x1c   : > { %v325_v1 = vld [vmem:[%s3155_s23] sm:$0xff]  ;;  %v326_v2 = vld [vmem:[%s3155_s23 + $0x8] sm:$0xff]  ;;  %v327_v3 = vld [vmem:[%s3155_s23 + $0x10] sm:$0xff]  ;;  %s2714_s21 = sshll.u32 %s313_s20, 4  ;;  %s4740_s24 = scalar_lea.hbm %s4793_s8, %s2831_s19  ;;  %s4735_s21 = int_to_ptr.vmem [resolvable:$true] %s2714_s21 }
  0x1d   : > { %v373_v4 = vpack.c.bf16 %v326_v2, %v325_v1  ;;  %v328_v5 = vld [vmem:[%s3155_s23 + $0x18] sm:$0xff]  ;;  %v329_v6 = vld [vmem:[%s3155_s23 + $0x20] sm:$0xff]  ;;  %v330_v7 = vld [vmem:[%s3155_s23 + $0x28] sm:$0xff]  ;;  %s4744_s9 = scalar_lea.sflag [#allocation3], %s311_s10  ;;  %s2983_s25 = scalar_lea.vmem %s4735_s21, 512 }
  0x1e   : > { %v374_v8 = vpack.c.bf16 %v328_v5, %v327_v3  ;;  %v375_v9 = vpack.c.bf16 %v330_v7, %v329_v6  ;;  %v331_v10 = vld [vmem:[%s3155_s23 + $0x30] sm:$0xff]  ;;  %v332_v11 = vld [vmem:[%s3155_s23 + $0x38] sm:$0xff]  ;;  %v333_v12 = vld [vmem:[%s3155_s23 + $0x40] sm:$0xff]  ;;  %p2984_p11 = scmp.ne.s32.totalorder %s4735_s21, %s2983_s25  ;;  %s3048_s26 = smov [#allocation2]  }
  0x1f   : > { %2877 = vmatprep.mubr.msk.bf16.mxu0 %vm405_vm0, %v373_v4  ;;  %v334_v13 = vld [vmem:[%s3155_s23 + $0x48] sm:$0xff]  ;;  %v376_v14 = vpack.c.bf16 %v332_v11, %v331_v10  ;;  %v335_v16 = vld [vmem:[%s3155_s23 + $0x50] sm:$0xff]  ;;  %v336_v17 = vld [vmem:[%s3155_s23 + $0x58] sm:$0xff]  ;;  %s2987_s12 = sshll.u32 %s3048_s26, 4  ;;  %s2988_s12 = int_to_ptr.vmem [resolvable:$false] %s2987_s12 }
  0x20   : > { %2878 = vmatmul.mubr.msk.bf16.vlgmr.msra.gmra.mrb[0].mxu0 %vm405_vm0, %v374_v8  ;;  %v377_v15 = vpack.c.bf16 %v334_v13, %v333_v12  ;;  %v337_v18 = vld [vmem:[%s3155_s23 + $0x60] sm:$0xff]  ;;  %v338_v19 = vld [vmem:[%s3155_s23 + $0x68] sm:$0xff]  ;;  %v378_v20 = vpack.c.bf16 %v336_v17, %v335_v16  ;;  %v339_v22 = vld [vmem:[%s3155_s23 + $0x70] sm:$0xff]  ;;  %p2985_p12 = pnand %p2984_p11, %p3134_p5  ;;  %s2989_s13 = scalar_lea.vmem %s2988_s12, 1024 }
  0x21   : > { %2881 = vmatprep.mubr.msk.bf16.mxu0 %vm405_vm0, %v375_v9  ;;  %v379_v21 = vpack.c.bf16 %v338_v19, %v337_v18  ;;  %v340_v23 = vld [vmem:[%s3155_s23 + $0x78] sm:$0xff]  ;;  %v341_v24 = vld [vmem:[%s3155_s23 + $0x80] sm:$0xff]  ;;  %v342_v25 = vld [vmem:[%s3155_s23 + $0x88] sm:$0xff]  ;;  %v852_v9 = vlaneseq  ;;  %p2990_p0 = scmp.lt.s32.totalorder %s4735_s21, %s2988_s12  ;;  %p2991_p1 = scmp.lt.s32.totalorder %s2989_s13, %s2983_s25 }
  0x22   : > { %v380_v26 = vpack.c.bf16 %v340_v23, %v339_v22  ;;  %v381_v27 = vpack.c.bf16 %v342_v25, %v341_v24  ;;  %v343_v28 = vld [vmem:[%s3155_s23 + $0x90] sm:$0xff]  ;;  %v344_v29 = vld [vmem:[%s3155_s23 + $0x98] sm:$0xff]  ;;  %v345_v30 = vld [vmem:[%s3155_s23 + $0xa0] sm:$0xff]  ;;  %p2986_p13 = pneg %p2985_p12 }
  0x23   : > { %v346_v31 = vld [vmem:[%s3155_s23 + $0xa8] sm:$0xff]  ;;  %v382_v32 = vpack.c.bf16 %v344_v29, %v343_v28  ;;  %v347_v34 = vld [vmem:[%s3155_s23 + $0xb0] sm:$0xff]  ;;  %v348_v35 = vld [vmem:[%s3155_s23 + $0xb8] sm:$0xff]  ;;  %v853_v10 = vshrl.u32 %v852_v9, 7  ;;  %p2992_p2 = por %p2991_p1, %p2990_p0 }
  0x24   : > { %v383_v33 = vpack.c.bf16 %v346_v31, %v345_v30  ;;  %v349_v36 = vld [vmem:[%s3155_s23 + $0xc0] sm:$0xff]  ;;  %v350_v37 = vld [vmem:[%s3155_s23 + $0xc8] sm:$0xff]  ;;  %v384_v38 = vpack.c.bf16 %v348_v35, %v347_v34  ;;  %v351_v40 = vld [vmem:[%s3155_s23 + $0xd0] sm:$0xff] }
  0x25   : > { %v385_v39 = vpack.c.bf16 %v350_v37, %v349_v36  ;;  %v352_v41 = vld [vmem:[%s3155_s23 + $0xd8] sm:$0xff]  ;;  %v353_v42 = vld [vmem:[%s3155_s23 + $0xe0] sm:$0xff]  ;;  %v354_v43 = vld [vmem:[%s3155_s23 + $0xe8] sm:$0xff]  ;;  %v854_v11 = vsub.s32 0, %v853_v10  ;;  %v1062_v13 = vsub.s32 1, %v853_v10  ;;  %v1299_v17 = vsub.s32 4, %v853_v10  ;;  %p2993_p3 = pnand %p2992_p2, %p2986_p13 }
  0x26   : > { %v386_v44 = vpack.c.bf16 %v352_v41, %v351_v40  ;;  %v387_v45 = vpack.c.bf16 %v354_v43, %v353_v42  ;;  %v355_v46 = vld [vmem:[%s3155_s23 + $0xf0] sm:$0xff]  ;;  %v356_v47 = vld [vmem:[%s3155_s23 + $0xf8] sm:$0xff]  ;;  %v357_v48 = vld [vmem:[%s3155_s23 + $0x100] sm:$0xff]  ;;  %v2016_v19 = vsub.s32 5, %v853_v10  ;;  %v1543_v24 = vsub.s32 7, %v853_v10 }
  0x27   : > { %v358_v49 = vld [vmem:[%s3155_s23 + $0x108] sm:$0xff]  ;;  %v388_v50 = vpack.c.bf16 %v356_v47, %v355_v46  ;;  %v359_v52 = vld [vmem:[%s3155_s23 + $0x110] sm:$0xff]  ;;  %v360_v53 = vld [vmem:[%s3155_s23 + $0x118] sm:$0xff]  ;;  %v995_v25 = vsub.s32 6, %v853_v10 }
  0x28   : > { %2882 = vmatmul.mubr.msk.bf16.gmra.mrb[4].mxu0 %vm405_vm0, %v376_v14  ;;  %v389_v51 = vpack.c.bf16 %v358_v49, %v357_v48  ;;  %v361_v54 = vld [vmem:[%s3155_s23 + $0x120] sm:$0xff]  ;;  %v362_v55 = vld [vmem:[%s3155_s23 + $0x128] sm:$0xff]  ;;  %v390_v56 = vpack.c.bf16 %v360_v53, %v359_v52  ;;  %v363_v58 = vld [vmem:[%s3155_s23 + $0x130] sm:$0xff]  ;;  %v1779_v14 = vsub.s32 2, %v853_v10 }
  0x29   : > { %2885 = vmatprep.mubr.msk.bf16.mxu0 %vm405_vm0, %v377_v15  ;;  %v391_v57 = vpack.c.bf16 %v362_v55, %v361_v54  ;;  %v364_v59 = vld [vmem:[%s3155_s23 + $0x138] sm:$0xff]  ;;  %v365_v60 = vld [vmem:[%s3155_s23 + $0x140] sm:$0xff]  ;;  %v366_v61 = vld [vmem:[%s3155_s23 + $0x148] sm:$0xff] }
  0x2a   : > { %v392_v62 = vpack.c.bf16 %v364_v59, %v363_v58  ;;  %v393_v63 = vpack.c.bf16 %v366_v61, %v365_v60  ;;  %v367_v0 = vld [vmem:[%s3155_s23 + $0x150] sm:$0xff]  ;;  %v368_v1 = vld [vmem:[%s3155_s23 + $0x158] sm:$0xff]  ;;  %v369_v2 = vld [vmem:[%s3155_s23 + $0x160] sm:$0xff] }
  0x2b   : > { %v370_v3 = vld [vmem:[%s3155_s23 + $0x168] sm:$0xff]  ;;  %v394_v4 = vpack.c.bf16 %v368_v1, %v367_v0  ;;  %v371_v6 = vld [vmem:[%s3155_s23 + $0x170] sm:$0xff]  ;;  %v372_v7 = vld [vmem:[%s3155_s23 + $0x178] sm:$0xff] }
  0x2c   : > { %v395_v5 = vpack.c.bf16 %v370_v3, %v369_v2  ;;  %v396_v8 = vpack.c.bf16 %v372_v7, %v371_v6  ;;  %v850_v12 = vld [vmem:[%s4788_s3] sm:$0xff]  ;;  %v3237_v16 = vld [vmem:[%s4787_s2 + $0x10] sm:$0xff]  ;;  %v3252_v28 = vld [vmem:[%s4787_s2 + $0x8] sm:$0xff] }
  0x2d   : > { %v3232_v15 = vrot.slane %v850_v12, %v854_v11  ;;  %v3239_v18 = vrot.slane %v850_v12, %v1062_v13  ;;  %v3246_v23 = vrot.slane %v850_v12, %v1779_v14  ;;  %v3258_v31 = vrot.slane %v850_v12, %v1299_v17 }
  0x2e   : > { %v3269_v37 = vrot.slane %v850_v12, %v2016_v19  ;;  %v3275_v43 = vrot.slane %v850_v12, %v1543_v24 }
  0x2f   : > { %v856_v29 = vmul.f32 0.0, %v3232_v15  ;;  %v3256_v30 = vmul.f32 0.0, %v3239_v18  ;;  %v3267_v35 = vmul.f32 0.0, %v3246_v23 }
  0x30   : > { %2886 = vmatmul.mubr.msk.bf16.gmra.mrb[8].mxu0 %vm405_vm0, %v378_v20  ;;  %v3244_v20 = vld [vmem:[%s4787_s2] sm:$0xff] }
  0x31   : > { %2889 = vmatprep.mubr.msk.bf16.mxu0 %vm405_vm0, %v379_v21  ;;  %v927_v21 = vsub.s32 3, %v853_v10  ;;  %v1157_v48 = vrot.slane %v3256_v30, 1 }
  0x38   : > { %2890 = vmatmul.mubr.msk.bf16.gmra.mrb[12].mxu0 %vm405_vm0, %v380_v26 }
  0x39   : > { %2893 = vmatprep.mubr.msk.bf16.mxu0 %vm405_vm0, %v381_v27 }
  0x40   : > { %2894 = vmatmul.mubr.msk.bf16.gmra.mrb[16].mxu0 %vm405_vm0, %v382_v32 }
  0x41   : > { %2897 = vmatprep.mubr.msk.bf16.mxu0 %vm405_vm0, %v383_v33  ;;  %v3264_v33 = vld [vmem:[%s4789_s4] ss:$0 sm:$0xff] }
  0x42   : > { %v894_v47 = vadd.f32 %v3264_v33, %v856_v29 }
  0x48   : > { %2898 = vmatmul.mubr.msk.bf16.gmra.mrb[20].mxu0 %vm405_vm0, %v384_v38  ;;  %v3271_v38 = vrot.slane %v850_v12, %v927_v21 }
  0x49   : > { %2901 = vmatprep.mubr.msk.bf16.mxu0 %vm405_vm0, %v385_v39 }
  0x50   : > { %2902 = vmatmul.mubr.msk.bf16.gmra.mrb[24].mxu0 %vm405_vm0, %v386_v44  ;;  %v3277_v44 = vrot.slane %v850_v12, %v995_v25 }
  0x51   : > { %2905 = vmatprep.mubr.msk.bf16.mxu0 %vm405_vm0, %v387_v45 }
  0x52   : > { %v3285_v52 = vmul.f32 0.0, %v3277_v44 }
  0x54   : > { %4880 = vst [vmem:[#allocation6_spill] sm:$0xff] %v3285_v52 }
  0x58   : > { %2906 = vmatmul.mubr.msk.bf16.gmra.mrb[28].mxu0 %vm405_vm0, %v388_v50 }
  0x59   : > { %2909 = vmatprep.mubr.msk.bf16.mxu0 %vm405_vm0, %v389_v51  ;;  %v1874_v51 = vrot.slane %v3267_v35, 2 }
  0x60   : > { %2910 = vmatmul.mubr.msk.bf16.gmra.mrb[32].mxu0 %vm405_vm0, %v390_v56 }
  0x61   : > { %2913 = vmatprep.mubr.msk.bf16.mxu0 %vm405_vm0, %v391_v57 }
  0x68   : > { %2914 = vmatmul.mubr.msk.bf16.gmra.mrb[36].mxu0 %vm405_vm0, %v392_v62 }
  0x69   : > { %2917 = vmatprep.mubr.msk.bf16.mxu0 %vm405_vm0, %v393_v63 }
  0x70   : > { %2918 = vmatmul.mubr.msk.bf16.gmra.mrb[40].mxu0 %vm405_vm0, %v394_v4 }
  0x71   : > { %2921 = vmatprep.mubr.msk.bf16.mxu0 %vm405_vm0, %v395_v5 }
  0x78   : > { %2922 = vmatmul.mubr.msk.bf16.gmra.mrb[44].mxu0 %vm405_vm0, %v396_v8 }
  0xf3   : > { %v2879_v22 = vpop.f32.mrb[0].mxu0 }
  0xf4   : > { %v708_v26 = vadd.f32 %v2879_v22, %v3237_v16  ;;  %v512_v27 = vpop.f32.mrb[1].mxu0 }
  0xf5   : > { %v706_v32 = vadd.f32 %v3244_v20, %v512_v27  ;;  %v2880_v34 = vpop.f32.mrb[2].mxu0 }
  0xf6   : > { %v756_v36 = vmax.f32 %v708_v26, 0.0  ;;  %v709_v39 = vadd.f32 %v2880_v34, %v3244_v20  ;;  %v515_v40 = vpop.f32.mrb[3].mxu0 }
  0xf7   : > { %v754_v41 = vmax.f32 %v706_v32, 0.0  ;;  %v707_v42 = vadd.f32 %v3252_v28, %v515_v40 }
  0xf8   : > { %v804_v45 = vmin.f32 %v756_v36, 6.0  ;;  %v757_v46 = vmax.f32 %v709_v39, 0.0 }
  0xf9   : > { %v3281_v49 = vmin.f32 %v754_v41, 6.0  ;;  %v755_v50 = vmax.f32 %v707_v42, 0.0 }
  0xfa   : > { %v3288_v53 = vmul.f32 %v3239_v18, %v804_v45  ;;  %v3291_v54 = vmul.f32 %v3258_v31, %v804_v45  ;;  %v3294_v55 = vmul.f32 %v3246_v23, %v804_v45  ;;  %v3297_v56 = vmul.f32 %v3269_v37, %v804_v45 }
  0xfb   : > { %4879 = vst [vmem:[#allocation5_spill] sm:$0xff] %v3281_v49  ;;  %v857_v57 = vmul.f32 %v3232_v15, %v3281_v49  ;;  %v929_v58 = vmul.f32 %v3271_v38, %v3281_v49  ;;  %v3305_v59 = vmul.f32 %v3239_v18, %v3281_v49  ;;  %v3307_v60 = vmin.f32 %v757_v46, 6.0  ;;  %v2883_v61 = vpop.f32.mrb[4].mxu0 }
  0xfc   : > { %4881 = vst [vmem:[#allocation7_spill] sm:$0xff] %v3294_v55  ;;  %v1400_v63 = vrot.slane %v3291_v54, 1  ;;  %v2117_v1 = vrot.slane %v3297_v56, 2  ;;  %v528_v2 = vpop.f32.mrb[5].mxu0  ;;  %v3317_v5 = vmin.f32 %v755_v50, 6.0  ;;  %v712_v6 = vadd.f32 %v2883_v61, %v3244_v20 }
  0xfd   : > { %v3314_v3 = vadd.f32 %v3264_v33, %v857_v57  ;;  %v2884_v7 = vpop.f32.mrb[6].mxu0  ;;  %v710_v8 = vadd.f32 %v3252_v28, %v528_v2  ;;  %v961_v11 = vadd.f32 %v929_v58, %v894_v47  ;;  %v997_v12 = vmul.f32 %v3277_v44, %v3307_v60 }
  0xfe   : > { %4882 = vst [vmem:[#allocation8_spill] sm:$0xff] %v3317_v5  ;;  %v713_v9 = vadd.f32 %v2884_v7, %v3252_v28  ;;  %v531_v10 = vpop.f32.mrb[7].mxu0  ;;  %v858_v13 = vmul.f32 %v3232_v15, %v3317_v5  ;;  %v930_v14 = vmul.f32 %v3271_v38, %v3317_v5  ;;  %v3330_v17 = vmul.f32 %v3239_v18, %v3317_v5 }
  0xff   : > { %v760_v19 = vmax.f32 %v712_v6, 0.0  ;;  %v758_v21 = vmax.f32 %v710_v8, 0.0  ;;  %v711_v24 = vadd.f32 %v3237_v16, %v531_v10  ;;  %v1028_v25 = vadd.f32 %v997_v12, %v961_v11 }
 0x100   : > { %v761_v22 = vmax.f32 %v713_v9, 0.0  ;;  %v3334_v26 = vadd.f32 %v3264_v33, %v858_v13  ;;  %v962_v32 = vadd.f32 %v930_v14, %v894_v47  ;;  %v1301_v42 = vmul.f32 %v3258_v31, %v3281_v49 }
 0x101   : > { %v3337_v29 = vmin.f32 %v760_v19, 6.0  ;;  %v3339_v34 = vmin.f32 %v758_v21, 6.0  ;;  %v759_v39 = vmax.f32 %v711_v24, 0.0  ;;  %v1265_v40 = vadd.f32 %v1157_v48, %v1028_v25 }
 0x102   : > { %v3341_v36 = vmin.f32 %v761_v22, 6.0  ;;  %v1302_v45 = vmul.f32 %v3258_v31, %v3317_v5  ;;  %v1545_v46 = vmul.f32 %v3275_v43, %v3307_v60  ;;  %v3353_v47 = vmul.f32 %v3269_v37, %v3281_v49 }
 0x103   : > { %v2887_v41 = vpop.f32.mrb[8].mxu0  ;;  %v3355_v50 = vmin.f32 %v759_v39, 6.0  ;;  %v998_v61 = vmul.f32 %v3277_v44, %v3339_v34  ;;  %v1546_v2 = vmul.f32 %v3275_v43, %v3339_v34  ;;  %v1397_v8 = vrot.slane %v1301_v42, 1 }
 0x104   : > { %v716_v57 = vadd.f32 %v2887_v41, %v3252_v28  ;;  %v544_v58 = vpop.f32.mrb[9].mxu0  ;;  %v1398_v9 = vrot.slane %v1302_v45, 1  ;;  %v1637_v10 = vrot.slane %v1545_v46, 1  ;;  %v931_v56 = vmul.f32 %v3271_v38, %v3307_v60 }
 0x105   : > { %4883 = vst [vmem:[#allocation9_spill] sm:$0xff] %v3355_v50  ;;  %v714_v6 = vadd.f32 %v3237_v16, %v544_v58  ;;  %v2888_v7 = vpop.f32.mrb[10].mxu0  ;;  %v3365_v11 = vmul.f32 %v3239_v18, %v3355_v50  ;;  %v3369_v12 = vmul.f32 %v3258_v31, %v3355_v50  ;;  %v1029_v24 = vadd.f32 %v998_v61, %v962_v32 }
 0x106   : > { %v764_v13 = vmax.f32 %v716_v57, 0.0  ;;  %v717_v14 = vadd.f32 %v2888_v7, %v3237_v16  ;;  %v547_v19 = vpop.f32.mrb[11].mxu0  ;;  %v1399_v25 = vsel %vm1156_vm1, %v1397_v8, %v1398_v9  ;;  %v1547_v7 = vmul.f32 %v3275_v43, %v3355_v50 }
 0x107   : > { %4884 = vst [vmem:[#allocation10_spill] sm:$0xff] %v3365_v11  ;;  %4885 = vst [vmem:[#allocation11_spill] sm:$0xff] %v3369_v12  ;;  %v762_v21 = vmax.f32 %v714_v6, 0.0  ;;  %v715_v22 = vadd.f32 %v3244_v20, %v547_v19  ;;  %v1266_v57 = vadd.f32 %v1157_v48, %v1029_v24  ;;  %v1401_v6 = vsel %vm1156_vm1, %v1398_v9, %v1400_v63 }
 0x108   : > { %v3376_v42 = vmin.f32 %v764_v13, 6.0  ;;  %v765_v45 = vmax.f32 %v717_v14, 0.0  ;;  %v1509_v61 = vadd.f32 %v1399_v25, %v1265_v40  ;;  %v1638_v8 = vrot.slane %v1546_v2, 1 }
 0x109   : > { %v3378_v46 = vmin.f32 %v762_v21, 6.0  ;;  %v763_v58 = vmax.f32 %v715_v22, 0.0  ;;  %v1510_v63 = vadd.f32 %v1401_v6, %v1266_v57 }
 0x10a   : > { %4886 = vst [vmem:[#allocation12_spill] sm:$0xff] %v3376_v42  ;;  %v3385_v32 = vmin.f32 %v765_v45, 6.0  ;;  %v1639_v19 = vsel %vm1156_vm1, %v1637_v10, %v1638_v8  ;;  %v1640_v45 = vrot.slane %v1547_v7, 1  ;;  %v3422_v7 = vld [vmem:[%s4788_s3 + $0x8] ss:$0 sm:$0xff] }
 0x10b   : > { %4887 = vst [vmem:[#allocation13_spill] sm:$0xff] %v3378_v46  ;;  %v3391_v13 = vmul.f32 %v3239_v18, %v3378_v46  ;;  %v3395_v30 = vmul.f32 %v3258_v31, %v3378_v46  ;;  %v3397_v48 = vmin.f32 %v763_v58, 6.0  ;;  %v2891_v54 = vpop.f32.mrb[12].mxu0  ;;  %v1745_v21 = vadd.f32 %v1639_v19, %v1509_v61 }
 0x10c   : > { %4888 = vst [vmem:[#allocation14_spill] sm:$0xff] %v3385_v32  ;;  %v3401_v9 = vmul.f32 %v3239_v18, %v3385_v32  ;;  %v3405_v40 = vmul.f32 %v3258_v31, %v3385_v32  ;;  %v720_v2 = vadd.f32 %v2891_v54, %v3237_v16  ;;  %v560_v14 = vpop.f32.mrb[13].mxu0  ;;  %v1641_v10 = vsel %vm1156_vm1, %v1638_v8, %v1640_v45 }
 0x10d   : > { %4889 = vst [vmem:[#allocation15_spill] sm:$0xff] %v3391_v13  ;;  %4890 = vst [vmem:[#allocation16_spill] sm:$0xff] %v3395_v30  ;;  %v718_v24 = vadd.f32 %v3244_v20, %v560_v14  ;;  %v2892_v25 = vpop.f32.mrb[14].mxu0  ;;  %v1746_v14 = vadd.f32 %v1641_v10, %v1510_v63  ;;  %v2114_v61 = vrot.slane %v3353_v47, 2  ;;  %v2262_v47 = vmul.f32 %v3422_v7, %v3307_v60 }
 0x10e   : > { %4891 = vst [vmem:[#allocation17_spill] sm:$0xff] %v3397_v48  ;;  %4892 = vst [vmem:[#allocation18_spill] sm:$0xff] %v3401_v9  ;;  %v768_v6 = vmax.f32 %v720_v2, 0.0  ;;  %v721_v39 = vadd.f32 %v2892_v25, %v3244_v20  ;;  %v563_v0 = vpop.f32.mrb[15].mxu0  ;;  %v2019_v2 = vmul.f32 %v3269_v37, %v3317_v5  ;;  %v2264_v35 = vmul.f32 %v3422_v7, %v3355_v50 }
 0x10f   : > { %4893 = vst [vmem:[#allocation19_spill] sm:$0xff] %v3405_v40  ;;  %v766_v54 = vmax.f32 %v718_v24, 0.0  ;;  %v719_v41 = vadd.f32 %v3252_v28, %v563_v0  ;;  %v1982_v0 = vadd.f32 %v1874_v51, %v1745_v21  ;;  %v1983_v19 = vadd.f32 %v1874_v51, %v1746_v14 }
 0x110   : > { %v3417_v62 = vmin.f32 %v768_v6, 6.0  ;;  %v769_v22 = vmax.f32 %v721_v39, 0.0  ;;  %v2115_v6 = vrot.slane %v2019_v2, 2  ;;  %v2263_v21 = vmul.f32 %v3422_v7, %v3339_v34 }
 0x111   : > { %v3426_v25 = vmin.f32 %v766_v54, 6.0  ;;  %v767_v24 = vmax.f32 %v719_v41, 0.0  ;;  %v2354_v57 = vrot.slane %v2262_v47, 2 }
 0x112   : > { %4894 = vst [vmem:[#allocation20_spill] sm:$0xff] %v3417_v62  ;;  %v3433_v39 = vmul.f32 %v3239_v18, %v3417_v62  ;;  %v3437_v8 = vmul.f32 %v3258_v31, %v3417_v62  ;;  %v3439_v63 = vmin.f32 %v769_v22, 6.0  ;;  %v2116_v2 = vsel %vm1873_vm2, %v2114_v61, %v2115_v6 }
 0x113   : > { %4895 = vst [vmem:[#allocation21_spill] sm:$0xff] %v3426_v25  ;;  %v3443_v45 = vmin.f32 %v767_v24, 6.0  ;;  %v2895_v41 = vpop.f32.mrb[16].mxu0  ;;  %v2118_v24 = vsel %vm1873_vm2, %v2115_v6, %v2117_v1  ;;  %v2226_v27 = vadd.f32 %v2116_v2, %v1982_v0  ;;  %v2355_v9 = vrot.slane %v2263_v21, 2 }
 0x114   : > { %4896 = vst [vmem:[#allocation22_spill] sm:$0xff] %v3433_v39  ;;  %4897 = vst [vmem:[#allocation23_spill] sm:$0xff] %v3437_v8  ;;  %v724_v22 = vadd.f32 %v2895_v41, %v3244_v20  ;;  %v576_v58 = vpop.f32.mrb[17].mxu0  ;;  %v2227_v41 = vadd.f32 %v2118_v24, %v1983_v19  ;;  %v932_v1 = vmul.f32 %v3271_v38, %v3339_v34 }
 0x115   : > { %4898 = vst [vmem:[#allocation24_spill] sm:$0xff] %v3439_v63  ;;  %4899 = vst [vmem:[#allocation25_spill] sm:$0xff] %v3443_v45  ;;  %v722_v51 = vadd.f32 %v3252_v28, %v576_v58  ;;  %v2896_v14 = vpop.f32.mrb[18].mxu0  ;;  %v2357_v63 = vrot.slane %v2264_v35, 2  ;;  %v2356_v0 = vsel %vm1873_vm2, %v2354_v57, %v2355_v9 }
 0x116   : > { %v772_v4 = vmax.f32 %v724_v22, 0.0  ;;  %v725_v54 = vadd.f32 %v2896_v14, %v3252_v28  ;;  %v579_v10 = vpop.f32.mrb[19].mxu0  ;;  %v2462_v21 = vadd.f32 %v2356_v0, %v2226_v27  ;;  %v964_v35 = vadd.f32 %v932_v1, %v3334_v26 }
 0x117   : > { %v770_v39 = vmax.f32 %v722_v51, 0.0  ;;  %v723_v8 = vadd.f32 %v3237_v16, %v579_v10  ;;  %v2358_v19 = vsel %vm1873_vm2, %v2355_v9, %v2357_v63  ;;  %v4904_v27 = vrot.slane %v3330_v17, 1 }
 0x118   : > { %v3461_v58 = vmin.f32 %v772_v4, 6.0  ;;  %v773_v62 = vmax.f32 %v725_v54, 0.0  ;;  %v2463_v4 = vadd.f32 %v2358_v19, %v2227_v41  ;;  %v963_v54 = vadd.f32 %v931_v56, %v3314_v3 }
 0x119   : > { %v3467_v61 = vmin.f32 %v770_v39, 6.0  ;;  %v771_v6 = vmax.f32 %v723_v8, 0.0  ;;  %v999_v39 = vmul.f32 %v3277_v44, %v3337_v29  ;;  %v1000_v8 = vmul.f32 %v3277_v44, %v3341_v36 }
 0x11a   : > { %4900 = vst [vmem:[#allocation26_spill] sm:$0xff] %v3461_v58  ;;  %v3471_v47 = vmin.f32 %v773_v62, 6.0  ;;  %v2494_v62 = vmax.f32 %v2462_v21, 0.0  ;;  %v2495_v63 = vmax.f32 %v2463_v4, 0.0  ;;  %v4905_v3 = vrot.slane %v3305_v59, 1 }
 0x11b   : > { %4901 = vst [vmem:[#allocation27_spill] sm:$0xff] %v3467_v61  ;;  %v3474_v10 = vmin.f32 %v771_v6, 6.0  ;;  %v2899_v22 = vpop.f32.mrb[20].mxu0  ;;  %v1030_v41 = vadd.f32 %v999_v39, %v963_v54 }
 0x11c   : > { %4902 = vst [vmem:[#allocation28_spill] sm:$0xff] %v3471_v47  ;;  %v728_v57 = vadd.f32 %v2899_v22, %v3252_v28  ;;  %v592_v9 = vpop.f32.mrb[21].mxu0  ;;  %v1161_v51 = vsel %vm1156_vm1, %v4905_v3, %v4904_v27  ;;  %v2526_v0 = vmin.f32 %v2494_v62, 6.0  ;;  %v2527_v59 = vmin.f32 %v2495_v63, 6.0 }
 0x11d   : > { %4903 = vst [vmem:[#allocation29_spill] sm:$0xff] %v3474_v10  ;;  %v3489_v26 = vmul.f32 %v3239_v18, %v3474_v10  ;;  %v3493_v14 = vmul.f32 %v3258_v31, %v3474_v10  ;;  %v726_v2 = vadd.f32 %v3237_v16, %v592_v9  ;;  %v2900_v24 = vpop.f32.mrb[22].mxu0  ;;  %v3502_v9 = vadd.f32 %v1000_v8, %v964_v35 }
 0x11e   : > { %v776_v56 = vmax.f32 %v728_v57, 0.0  ;;  %v729_v1 = vadd.f32 %v2900_v24, %v3237_v16  ;;  %v595_v6 = vpop.f32.mrb[23].mxu0  ;;  %v2558_v47 = vpack.c.bf16 %v2527_v59, %v2526_v0  ;;  %v4910_v57 = vrot.slane %v3288_v53, 1 }
 0x11f   : > { %4906 = vst [vmem:[#allocation30_spill] sm:$0xff] %v3489_v26  ;;  %4907 = vst [vmem:[#allocation31_spill] sm:$0xff] %v3493_v14  ;;  %v774_v4 = vmax.f32 %v726_v2, 0.0  ;;  %v727_v22 = vadd.f32 %v3244_v20, %v595_v6  ;;  %v4911_v62 = vrot.slane %v3330_v17, 1  ;;  %v3513_v24 = vadd.f32 %v1161_v51, %v1030_v41 }
 0x120   : > { %v3500_v27 = vmin.f32 %v776_v56, 6.0  ;;  %v777_v3 = vmax.f32 %v729_v1, 0.0  ;;  %v3536_v1 = vsel %vm2593_vm3, %v2558_v47, 0 }
 0x121   : > { %v3504_v54 = vmin.f32 %v774_v4, 6.0  ;;  %v775_v39 = vmax.f32 %v727_v22, 0.0  ;;  %v3511_v63 = vsel %vm1156_vm1, %v4911_v62, %v4910_v57  ;;  %4912 = vst [vmem:[#allocation34_spill] sm:$0xff] %v3513_v24 }
 0x122   : > { %4908 = vst [vmem:[#allocation32_spill] sm:$0xff] %v3500_v27  ;;  %v3515_v2 = vmin.f32 %v777_v3, 6.0  ;;  %v872_v56 = vmul.f32 %v3232_v15, %v3500_v27  ;;  %v1087_v35 = vmul.f32 %v3239_v18, %v3500_v27  ;;  %v3523_v8 = vmul.f32 %v3246_v23, %v3500_v27 }
 0x123   : > { %4909 = vst [vmem:[#allocation33_spill] sm:$0xff] %v3504_v54  ;;  %v3527_v53 = vmul.f32 %v3239_v18, %v3504_v54  ;;  %v3531_v17 = vmul.f32 %v3258_v31, %v3504_v54  ;;  %v3533_v51 = vmin.f32 %v775_v39, 6.0  ;;  %v2903_v41 = vpop.f32.mrb[24].mxu0 }
 0x124   : > { %4913 = vst [vmem:[#allocation35_spill] sm:$0xff] %v3515_v2  ;;  %v1088_v6 = vmul.f32 %v3239_v18, %v3515_v2  ;;  %v3542_v0 = vmul.f32 %v3258_v31, %v3515_v2  ;;  %v732_v59 = vadd.f32 %v2903_v41, %v3237_v16  ;;  %v608_v4 = vpop.f32.mrb[25].mxu0  ;;  %v910_v22 = vadd.f32 %v3264_v33, %v872_v56 }
 0x125   : > { %4914 = vst [vmem:[#allocation36_spill] sm:$0xff] %v3527_v53  ;;  %4915 = vst [vmem:[#allocation37_spill] sm:$0xff] %v3531_v17  ;;  %v730_v57 = vadd.f32 %v3244_v20, %v608_v4  ;;  %v2904_v47 = vpop.f32.mrb[26].mxu0  ;;  %v871_v62 = vmul.f32 %v3232_v15, %v3533_v51  ;;  %v1086_v41 = vmul.f32 %v3239_v18, %v3533_v51  ;;  %v1195_v53 = vrot.slane %v1087_v35, 1 }
 0x126   : > { %4916 = vst [vmem:[#allocation38_spill] sm:$0xff] %v3533_v51  ;;  %4917 = vst [vmem:[#allocation39_spill] sm:$0xff] %v3542_v0  ;;  %v780_v21 = vmax.f32 %v732_v59, 0.0  ;;  %v733_v26 = vadd.f32 %v2904_v47, %v3244_v20  ;;  %v611_v27 = vpop.f32.mrb[27].mxu0  ;;  %v1197_v14 = vrot.slane %v1088_v6, 1  ;;  %v3563_v47 = vmul.f32 %v3246_v23, %v3533_v51 }
 0x127   : > { %v778_v56 = vmax.f32 %v730_v57, 0.0  ;;  %v731_v3 = vadd.f32 %v3252_v28, %v611_v27  ;;  %v909_v39 = vadd.f32 %v3264_v33, %v871_v62  ;;  %v1194_v54 = vrot.slane %v1086_v41, 1 }
 0x128   : > { %v3557_v4 = vmin.f32 %v780_v21, 6.0  ;;  %v781_v17 = vmax.f32 %v733_v26, 0.0  ;;  %v3567_v57 = vmul.f32 %v3246_v23, %v3515_v2  ;;  %v1198_v41 = vsel %vm1156_vm1, %v1195_v53, %v1197_v14 }
 0x129   : > { %v3559_v58 = vmin.f32 %v778_v56, 6.0  ;;  %v779_v59 = vmax.f32 %v731_v3, 0.0  ;;  %v1196_v35 = vsel %vm1156_vm1, %v1194_v54, %v1195_v53 }
 0x12a   : > { %4918 = vst [vmem:[#allocation40_spill] sm:$0xff] %v3557_v4  ;;  %v3571_v27 = vmul.f32 %v3239_v18, %v3557_v4  ;;  %v3575_v26 = vmul.f32 %v3246_v23, %v3557_v4  ;;  %v3577_v21 = vmin.f32 %v781_v17, 6.0  ;;  %v1327_v54 = vmul.f32 %v3258_v31, %v3557_v4 }
 0x12b   : > { %v3580_v6 = vmin.f32 %v779_v59, 6.0  ;;  %v2907_v3 = vpop.f32.mrb[28].mxu0  ;;  %v945_v62 = vmul.f32 %v3271_v38, %v3559_v58  ;;  %v1325_v56 = vmul.f32 %v3258_v31, %v3559_v58 }
 0x12c   : > { %v736_v0 = vadd.f32 %v2907_v3, %v3244_v20  ;;  %v624_v2 = vpop.f32.mrb[29].mxu0  ;;  %v1013_v17 = vmul.f32 %v3277_v44, %v3577_v21  ;;  %v1440_v13 = vrot.slane %v1327_v54, 1 }
 0x12d   : > { %4919 = vst [vmem:[#allocation41_spill] sm:$0xff] %v3580_v6  ;;  %v734_v59 = vadd.f32 %v3252_v28, %v624_v2  ;;  %v2908_v51 = vpop.f32.mrb[30].mxu0  ;;  %v946_v14 = vmul.f32 %v3271_v38, %v3580_v6  ;;  %v977_v53 = vadd.f32 %v945_v62, %v909_v39  ;;  %v1326_v10 = vmul.f32 %v3258_v31, %v3580_v6 }
 0x12e   : > { %v784_v19 = vmax.f32 %v736_v0, 0.0  ;;  %v737_v3 = vadd.f32 %v2908_v51, %v3252_v28  ;;  %v627_v61 = vpop.f32.mrb[31].mxu0  ;;  %v1437_v40 = vrot.slane %v1325_v56, 1  ;;  %v1569_v39 = vmul.f32 %v3275_v43, %v3577_v21 }
 0x12f   : > { %v782_v45 = vmax.f32 %v734_v59, 0.0  ;;  %v735_v25 = vadd.f32 %v3237_v16, %v627_v61  ;;  %v978_v30 = vadd.f32 %v946_v14, %v910_v22  ;;  %v1044_v32 = vadd.f32 %v1013_v17, %v977_v53 }
 0x130   : > { %v3600_v2 = vmin.f32 %v784_v19, 6.0  ;;  %v785_v11 = vmax.f32 %v737_v3, 0.0  ;;  %v1438_v42 = vrot.slane %v1326_v10, 1  ;;  %v1911_v51 = vrot.slane %v3563_v47, 2 }
 0x131   : > { %v3604_v62 = vmin.f32 %v782_v45, 6.0  ;;  %v783_v0 = vmax.f32 %v735_v25, 0.0  ;;  %v1281_v48 = vadd.f32 %v1196_v35, %v1044_v32  ;;  %v1677_v22 = vrot.slane %v1569_v39, 1 }
 0x132   : > { %v3607_v56 = vmin.f32 %v785_v11, 6.0  ;;  %v1439_v54 = vsel %vm1156_vm1, %v1437_v40, %v1438_v42  ;;  %v1441_v61 = vsel %vm1156_vm1, %v1438_v42, %v1440_v13  ;;  %v1912_v11 = vrot.slane %v3523_v8, 2 }
 0x133   : > { %v3611_v19 = vmin.f32 %v783_v0, 6.0  ;;  %v2911_v17 = vpop.f32.mrb[32].mxu0  ;;  %v1014_v10 = vmul.f32 %v3277_v44, %v3604_v62  ;;  %v1525_v59 = vadd.f32 %v1439_v54, %v1281_v48  ;;  %v1570_v25 = vmul.f32 %v3275_v43, %v3604_v62 }
 0x134   : > { %v740_v32 = vadd.f32 %v2911_v17, %v3252_v28  ;;  %v640_v45 = vpop.f32.mrb[33].mxu0  ;;  %v1914_v40 = vrot.slane %v3567_v57, 2  ;;  %v3622_v42 = vmul.f32 %v3269_v37, %v3559_v58 }
 0x135   : > { %v3626_v13 = vmul.f32 %v3239_v18, %v3611_v19  ;;  %v3630_v48 = vmul.f32 %v3258_v31, %v3611_v19  ;;  %v3634_v47 = vmul.f32 %v3246_v23, %v3611_v19  ;;  %v738_v8 = vadd.f32 %v3237_v16, %v640_v45  ;;  %v2912_v35 = vpop.f32.mrb[34].mxu0 }
 0x136   : > { %v788_v57 = vmax.f32 %v740_v32, 0.0  ;;  %v741_v14 = vadd.f32 %v2912_v35, %v3237_v16  ;;  %v643_v53 = vpop.f32.mrb[35].mxu0  ;;  %v1045_v3 = vadd.f32 %v1014_v10, %v978_v30  ;;  %v1571_v39 = vmul.f32 %v3275_v43, %v3611_v19 }
 0x137   : > { %4920 = vst [vmem:[#allocation42_spill] sm:$0xff] %v3626_v13  ;;  %4921 = vst [vmem:[#allocation43_spill] sm:$0xff] %v3634_v47  ;;  %v786_v17 = vmax.f32 %v738_v8, 0.0  ;;  %v739_v55 = vadd.f32 %v3244_v20, %v643_v53  ;;  %v1678_v5 = vrot.slane %v1570_v25, 1  ;;  %v1913_v30 = vsel %vm1873_vm2, %v1911_v51, %v1912_v11 }
 0x138   : > { %v3643_v50 = vmin.f32 %v788_v57, 6.0  ;;  %v789_v47 = vmax.f32 %v741_v14, 0.0  ;;  %v1282_v45 = vadd.f32 %v1198_v41, %v1045_v3  ;;  %v1680_v24 = vrot.slane %v1571_v39, 1 }
 0x139   : > { %v3645_v32 = vmin.f32 %v786_v17, 6.0  ;;  %v787_v35 = vmax.f32 %v739_v55, 0.0  ;;  %v1679_v0 = vsel %vm1156_vm1, %v1677_v22, %v1678_v5  ;;  %v1915_v8 = vsel %vm1873_vm2, %v1912_v11, %v1914_v40 }
 0x13a   : > { %4922 = vst [vmem:[#allocation44_spill] sm:$0xff] %v3643_v50  ;;  %v3648_v10 = vmin.f32 %v789_v47, 6.0  ;;  %v1526_v12 = vadd.f32 %v1441_v61, %v1282_v45  ;;  %v1681_v3 = vsel %vm1156_vm1, %v1678_v5, %v1680_v24  ;;  %v2043_v45 = vmul.f32 %v3269_v37, %v3580_v6 }
 0x13b   : > { %v3654_v57 = vmul.f32 %v3239_v18, %v3645_v32  ;;  %v3658_v41 = vmul.f32 %v3258_v31, %v3645_v32  ;;  %v3662_v55 = vmul.f32 %v3275_v43, %v3645_v32  ;;  %v3666_v51 = vmul.f32 %v3246_v23, %v3645_v32  ;;  %v2915_v61 = vpop.f32.mrb[36].mxu0 }
 0x13c   : > { %4923 = vst [vmem:[#allocation45_spill] sm:$0xff] %v3648_v10  ;;  %v3670_v22 = vmul.f32 %v3239_v18, %v3648_v10  ;;  %v3674_v25 = vmul.f32 %v3258_v31, %v3648_v10  ;;  %v3678_v11 = vmul.f32 %v3275_v43, %v3648_v10  ;;  %v3682_v40 = vmul.f32 %v3246_v23, %v3648_v10  ;;  %v656_v47 = vpop.f32.mrb[37].mxu0 }
 0x13d   : > { %4924 = vst [vmem:[#allocation46_spill] sm:$0xff] %v3654_v57  ;;  %4925 = vst [vmem:[#allocation47_spill] sm:$0xff] %v3658_v41  ;;  %v3687_v39 = vmin.f32 %v787_v35, 6.0  ;;  %v2916_v17 = vpop.f32.mrb[38].mxu0  ;;  %v744_v13 = vadd.f32 %v2915_v61, %v3237_v16  ;;  %v1761_v57 = vadd.f32 %v1679_v0, %v1525_v59  ;;  %v1762_v41 = vadd.f32 %v1681_v3, %v1526_v12 }
 0x13e   : > { %4926 = vst [vmem:[#allocation48_spill] sm:$0xff] %v3666_v51  ;;  %4927 = vst [vmem:[#allocation49_spill] sm:$0xff] %v3670_v22  ;;  %v659_v10 = vpop.f32.mrb[39].mxu0  ;;  %v745_v14 = vadd.f32 %v2916_v17, %v3244_v20  ;;  %v2044_v61 = vmul.f32 %v3269_v37, %v3557_v4  ;;  %v2155_v59 = vrot.slane %v2043_v45, 2 }
 0x13f   : > { %4928 = vst [vmem:[#allocation50_spill] sm:$0xff] %v3674_v25  ;;  %4929 = vst [vmem:[#allocation51_spill] sm:$0xff] %v3678_v11  ;;  %v743_v53 = vadd.f32 %v3252_v28, %v659_v10  ;;  %v792_v35 = vmax.f32 %v744_v13, 0.0  ;;  %v1999_v17 = vadd.f32 %v1915_v8, %v1762_v41  ;;  %v2154_v10 = vrot.slane %v3622_v42, 2 }
 0x140   : > { %4930 = vst [vmem:[#allocation52_spill] sm:$0xff] %v3682_v40  ;;  %4931 = vst [vmem:[#allocation53_spill] sm:$0xff] %v3687_v39  ;;  %v742_v40 = vadd.f32 %v3244_v20, %v656_v47  ;;  %v793_v22 = vmax.f32 %v745_v14, 0.0  ;;  %v1998_v47 = vadd.f32 %v1913_v30, %v1761_v57 }
 0x141   : > { %v791_v51 = vmax.f32 %v743_v53, 0.0  ;;  %v3701_v25 = vmin.f32 %v792_v35, 6.0 }
 0x142   : > { %v790_v54 = vmax.f32 %v742_v40, 0.0  ;;  %v3706_v5 = vmin.f32 %v793_v22, 6.0  ;;  %v2157_v22 = vrot.slane %v2044_v61, 2  ;;  %v2286_v61 = vmul.f32 %v3422_v7, %v3577_v21 }
 0x143   : > { %4932 = vst [vmem:[#allocation54_spill] sm:$0xff] %v3701_v25  ;;  %v3708_v12 = vmin.f32 %v791_v51, 6.0  ;;  %v2919_v24 = vpop.f32.mrb[40].mxu0  ;;  %v3712_v13 = vmul.f32 %v3239_v18, %v3701_v25  ;;  %v3716_v0 = vmul.f32 %v3258_v31, %v3701_v25  ;;  %v3720_v30 = vmul.f32 %v3275_v43, %v3701_v25 }
 0x144   : > { %v3704_v11 = vmin.f32 %v790_v54, 6.0  ;;  %4934 = vst [vmem:[#allocation56_spill] sm:$0xff] %v3706_v5  ;;  %v3724_v42 = vmul.f32 %v3246_v23, %v3701_v25  ;;  %v672_v54 = vpop.f32.mrb[41].mxu0  ;;  %v748_v8 = vadd.f32 %v2919_v24, %v3244_v20  ;;  %v2156_v51 = vsel %vm1873_vm2, %v2154_v10, %v2155_v59 }
 0x145   : > { %4935 = vst [vmem:[#allocation57_spill] sm:$0xff] %v3708_v12  ;;  %4936 = vst [vmem:[#allocation58_spill] sm:$0xff] %v3712_v13  ;;  %v746_v57 = vadd.f32 %v3252_v28, %v672_v54  ;;  %v2920_v41 = vpop.f32.mrb[42].mxu0  ;;  %v2158_v24 = vsel %vm1873_vm2, %v2155_v59, %v2157_v22  ;;  %v2242_v25 = vadd.f32 %v2156_v51, %v1998_v47  ;;  %v2394_v59 = vrot.slane %v2286_v61, 2 }
 0x146   : > { %4933 = vst [vmem:[#allocation55_spill] sm:$0xff] %v3704_v11  ;;  %4937 = vst [vmem:[#allocation59_spill] sm:$0xff] %v3716_v0  ;;  %v749_v3 = vadd.f32 %v2920_v41, %v3252_v28  ;;  %v675_v45 = vpop.f32.mrb[43].mxu0  ;;  %v796_v35 = vmax.f32 %v748_v8, 0.0  ;;  %v2243_v12 = vadd.f32 %v2158_v24, %v1999_v17  ;;  %v2287_v41 = vmul.f32 %v3422_v7, %v3604_v62 }
 0x147   : > { %4938 = vst [vmem:[#allocation60_spill] sm:$0xff] %v3720_v30  ;;  %4939 = vst [vmem:[#allocation61_spill] sm:$0xff] %v3724_v42  ;;  %v794_v4 = vmax.f32 %v746_v57, 0.0  ;;  %v747_v42 = vadd.f32 %v3237_v16, %v675_v45  ;;  %v2288_v57 = vmul.f32 %v3422_v7, %v3611_v19  ;;  %v3749_v47 = vmul.f32 %v3232_v15, %v3706_v5 }
 0x148   : > { %v797_v54 = vmax.f32 %v749_v3, 0.0  ;;  %v3737_v10 = vmin.f32 %v796_v35, 6.0  ;;  %v2395_v51 = vrot.slane %v2287_v41, 2 }
 0x149   : > { %v3739_v40 = vmin.f32 %v794_v4, 6.0  ;;  %v795_v14 = vmax.f32 %v747_v42, 0.0  ;;  %v2397_v3 = vrot.slane %v2288_v57, 2 }
 0x14a   : > { %v3743_v8 = vmin.f32 %v797_v54, 6.0 }
 0x14b   : > { %4940 = vst [vmem:[#allocation62_spill] sm:$0xff] %v3739_v40  ;;  %v3751_v17 = vmin.f32 %v795_v14, 6.0  ;;  %v2923_v22 = vpop.f32.mrb[44].mxu0  ;;  %v884_v4 = vmul.f32 %v3232_v15, %v3739_v40  ;;  %v3757_v42 = vmul.f32 %v3239_v18, %v3739_v40  ;;  %v2398_v53 = vsel %vm1873_vm2, %v2395_v51, %v2397_v3 }
 0x14c   : > { %v752_v45 = vadd.f32 %v2923_v22, %v3252_v28  ;;  %v688_v35 = vpop.f32.mrb[45].mxu0  ;;  %v886_v24 = vmul.f32 %v3232_v15, %v3743_v8  ;;  %v958_v14 = vmul.f32 %v3271_v38, %v3743_v8  ;;  %v2396_v22 = vsel %vm1873_vm2, %v2394_v59, %v2395_v51 }
 0x14d   : > { %4941 = vst [vmem:[#allocation63_spill] sm:$0xff] %v3751_v17  ;;  %v1106_v54 = vmul.f32 %v3239_v18, %v3751_v17  ;;  %v3768_v61 = vmul.f32 %v3258_v31, %v3751_v17  ;;  %v3772_v41 = vmul.f32 %v3275_v43, %v3751_v17  ;;  %v3776_v28 = vmul.f32 %v3246_v23, %v3751_v17  ;;  %v2924_v57 = vpop.f32.mrb[46].mxu0 }
 0x14e   : > { %v800_v13 = vmax.f32 %v752_v45, 0.0  ;;  %v750_v0 = vadd.f32 %v3237_v16, %v688_v35  ;;  %v691_v40 = vpop.f32.mrb[47].mxu0  ;;  %v2478_v50 = vadd.f32 %v2396_v22, %v2242_v25  ;;  %v2479_v39 = vadd.f32 %v2398_v53, %v2243_v12 }
 0x14f   : > { %4942 = vst [vmem:[#allocation64_spill] sm:$0xff] %v3776_v28  ;;  %v1227_v5 = vrot.slane %v1106_v54, 1  ;;  %v753_v28 = vadd.f32 %v2924_v57, %v3237_v16  ;;  %v922_v59 = vadd.f32 %v3264_v33, %v884_v4  ;;  %v924_v51 = vadd.f32 %v3264_v33, %v886_v24 }
 0x150   : > { %v3783_v49 = vmin.f32 %v800_v13, 6.0  ;;  %v798_v17 = vmax.f32 %v750_v0, 0.0  ;;  %v2510_v46 = vmax.f32 %v2478_v50, 0.0  ;;  %v3790_v3 = vmul.f32 %v3239_v18, %v3743_v8 }
 0x151   : > { %v2511_v45 = vmax.f32 %v2479_v39, 0.0  ;;  %v801_v16 = vmax.f32 %v753_v28, 0.0  ;;  %v990_v50 = vadd.f32 %v958_v14, %v922_v59  ;;  %v4864_v0 = vrot.slane %v3757_v42, 1 }
 0x152   : > { %4943 = vst [vmem:[#allocation65_spill] sm:$0xff] %v3783_v49  ;;  %4944 = vst [vmem:[#allocation66_spill] sm:$0xff] %v3790_v3  ;;  %v960_v35 = vmul.f32 %v3271_v38, %v3783_v49  ;;  %v1026_v25 = vmul.f32 %v3277_v44, %v3783_v49  ;;  %v3796_v12 = vmin.f32 %v798_v17, 6.0  ;;  %v2542_v13 = vmin.f32 %v2510_v46, 6.0 }
 0x153   : > { %v2543_v53 = vmin.f32 %v2511_v45, 6.0  ;;  %v849_v46 = vmin.f32 %v801_v16, 6.0  ;;  %v1228_v30 = vsel %vm1156_vm1, %v4864_v0, %v1227_v5  ;;  %v4863_v11 = vrot.slane %v3790_v3, 1 }
 0x154   : > { %4945 = vst [vmem:[#allocation67_spill] sm:$0xff] %v3796_v12  ;;  %v1109_v4 = vmul.f32 %v3239_v18, %v3796_v12  ;;  %v1345_v39 = vmul.f32 %v3258_v31, %v3796_v12  ;;  %v3805_v24 = vmul.f32 %v3275_v43, %v3796_v12  ;;  %v3809_v17 = vmul.f32 %v3246_v23, %v3796_v12 }
 0x155   : > { %v992_v54 = vadd.f32 %v960_v35, %v924_v51  ;;  %v1057_v14 = vadd.f32 %v1026_v25, %v990_v50  ;;  %v2566_v28 = vpack.c.bf16 %v2543_v53, %v2542_v13  ;;  %v3819_v12 = vmul.f32 %v3258_v31, %v3743_v8 }
 0x156   : > { %4946 = vst [vmem:[#allocation68_spill] sm:$0xff] %v3809_v17  ;;  %v1232_v57 = vrot.slane %v1109_v4, 1  ;;  %v1470_v22 = vrot.slane %v1345_v39, 1  ;;  %v3824_v35 = vmul.f32 %v3258_v31, %v3783_v49  ;;  %v1348_v25 = vmul.f32 %v3258_v31, %v849_v46 }
 0x157   : > { %v1059_v45 = vadd.f32 %v3285_v52, %v992_v54  ;;  %2925 = vmatprep.subr.msk.bf16.mxu1 %vm2593_vm3, %v2566_v28  ;;  %v1294_v51 = vadd.f32 %v1228_v30, %v1057_v14  ;;  %v3829_v13 = vmul.f32 %v3275_v43, %v3783_v49  ;;  %v4866_v16 = vrot.slane %v3819_v12, 1 }
 0x158   : > { %4947 = vst [vmem:[#allocation69_spill] sm:$0xff] %v3824_v35  ;;  %2858 = vmatpush3.bf16.xpose.msra.mxu1 %v3536_v1  ;;  %v1233_v5 = vsel %vm1156_vm1, %v4863_v11, %v1232_v57  ;;  %v1589_v30 = vmul.f32 %v3275_v43, %v849_v46  ;;  %v3838_v50 = vmul.f32 %v3269_v37, %v849_v46  ;;  %v4865_v4 = vrot.slane %v3824_v35, 1 }
 0x159   : > { %v1296_v53 = vadd.f32 %v1233_v5, %v1059_v45  ;;  %v1475_v39 = vrot.slane %v1348_v25, 1  ;;  %v4867_v54 = vrot.slane %v3829_v13, 1  ;;  %v1471_v1 = vsel %vm1156_vm1, %v4866_v16, %v1470_v22 }
 0x15a   : > { %4948 = vst [vmem:[#allocation70_spill] sm:$0xff] %v3838_v50  ;;  %v1710_v14 = vrot.slane %v1589_v30, 1  ;;  %v3847_v57 = vmul.f32 %v3422_v7, %v849_v46  ;;  %v1538_v45 = vadd.f32 %v1471_v1, %v1294_v51  ;;  %v751_v5 = vadd.f32 %v3244_v20, %v691_v40 }
 0x15b   : > { %v1476_v11 = vsel %vm1156_vm1, %v4865_v4, %v1475_v39  ;;  %v885_v25 = vmul.f32 %v3232_v15, %v3737_v10  ;;  %v921_v46 = vadd.f32 %v3264_v33, %v3749_v47  ;;  %v957_v20 = vmul.f32 %v3271_v38, %v3737_v10 }
 0x15c   : > { %4949 = vst [vmem:[#allocation71_spill] sm:$0xff] %v3847_v57  ;;  %v3855_v0 = vadd.f32 %v1476_v11, %v1296_v53  ;;  %v1711_v22 = vsel %vm1156_vm1, %v4867_v54, %v1710_v14  ;;  %v799_v39 = vmax.f32 %v751_v5, 0.0  ;;  %v873_v11 = vmul.f32 %v3232_v15, %v3559_v58 }
 0x15d   : > { %v3863_v28 = vadd.f32 %v1711_v22, %v1538_v45  ;;  %v923_v51 = vadd.f32 %v3264_v33, %v885_v25  ;;  %v874_v40 = vmul.f32 %v3232_v15, %v3580_v6  ;;  %v947_v53 = vmul.f32 %v3271_v38, %v3577_v21 }
 0x15e   : > { %4950 = vst [vmem:[#allocation72_spill] sm:$0xff] %v3855_v0  ;;  %v948_v47 = vmul.f32 %v3271_v38, %v3604_v62  ;;  %v3876_v1 = vmin.f32 %v799_v39, 6.0  ;;  %v989_v14 = vadd.f32 %v957_v20, %v921_v46  ;;  %v1015_v45 = vmul.f32 %v3277_v44, %v3600_v2  ;;  %v4965_v0 = vld [vmem:[#allocation42_spill] sm:$0xff] }
 0x15f   : > { %v1016_v5 = vmul.f32 %v3277_v44, %v3607_v56  ;;  %v911_v25 = vadd.f32 %v3264_v33, %v873_v11  ;;  %v912_v22 = vadd.f32 %v3264_v33, %v874_v40  ;;  %v1089_v4 = vmul.f32 %v3239_v18, %v3559_v58 }
 0x160   : > { %v1090_v30 = vmul.f32 %v3239_v18, %v3580_v6  ;;  %v959_v39 = vmul.f32 %v3271_v38, %v3876_v1  ;;  %v1025_v46 = vmul.f32 %v3277_v44, %v3876_v1  ;;  %v3894_v20 = vmul.f32 %v3258_v31, %v3876_v1 }
 0x161   : > { %v3898_v11 = vmul.f32 %v3275_v43, %v3876_v1  ;;  %v979_v33 = vadd.f32 %v947_v53, %v911_v25  ;;  %v980_v40 = vadd.f32 %v948_v47, %v912_v22  ;;  %v1199_v16 = vrot.slane %v1089_v4, 1 }
 0x162   : > { %v1200_v54 = vrot.slane %v1090_v30, 1  ;;  %v3900_v59 = vadd.f32 %v959_v39, %v923_v51  ;;  %v3902_v50 = vadd.f32 %v1025_v46, %v989_v14  ;;  %v4951_v57 = vrot.slane %v3571_v27, 1 }
 0x163   : > { %v1046_v3 = vadd.f32 %v1015_v45, %v979_v33  ;;  %v1047_v35 = vadd.f32 %v1016_v5, %v980_v40  ;;  %v1328_v4 = vmul.f32 %v3258_v31, %v3577_v21  ;;  %v1329_v30 = vmul.f32 %v3258_v31, %v3604_v62 }
 0x164   : > { %v1201_v52 = vsel %vm1156_vm1, %v1199_v16, %v1200_v54  ;;  %v1203_v49 = vsel %vm1156_vm1, %v1200_v54, %v4951_v57  ;;  %v1572_v51 = vmul.f32 %v3275_v43, %v3600_v2  ;;  %v1573_v53 = vmul.f32 %v3275_v43, %v3607_v56 }
 0x165   : > { %v1283_v47 = vadd.f32 %v1201_v52, %v1046_v3  ;;  %v1284_v14 = vadd.f32 %v1203_v49, %v1047_v35  ;;  %v1806_v16 = vmul.f32 %v3246_v23, %v3559_v58  ;;  %v1807_v27 = vmul.f32 %v3246_v23, %v3580_v6 }
 0x166   : > { %v1442_v54 = vrot.slane %v1328_v4, 1  ;;  %v1443_v57 = vrot.slane %v1329_v30, 1  ;;  %v1682_v45 = vrot.slane %v1572_v51, 1  ;;  %v1683_v5 = vrot.slane %v1573_v53, 1 }
 0x167   : > { %v1916_v25 = vrot.slane %v1806_v16, 2  ;;  %v1917_v22 = vrot.slane %v1807_v27, 2  ;;  %v1919_v39 = vrot.slane %v3575_v26, 2  ;;  %v2045_v46 = vmul.f32 %v3269_v37, %v3577_v21 }
 0x168   : > { %v1444_v52 = vsel %vm1156_vm1, %v1442_v54, %v1443_v57  ;;  %v4952_v49 = vrot.slane %v3630_v48, 1  ;;  %v1684_v35 = vsel %vm1156_vm1, %v1682_v45, %v1683_v5  ;;  %v4953_v33 = vrot.slane %v3662_v55, 1 }
 0x169   : > { %v1527_v4 = vadd.f32 %v1444_v52, %v1283_v47  ;;  %v1918_v51 = vsel %vm1873_vm2, %v1916_v25, %v1917_v22  ;;  %v1920_v26 = vsel %vm1873_vm2, %v1917_v22, %v1919_v39  ;;  %v2046_v53 = vmul.f32 %v3269_v37, %v3604_v62 }
 0x16a   : > { %v1446_v3 = vsel %vm1156_vm1, %v1443_v57, %v4952_v49  ;;  %v1686_v40 = vsel %vm1156_vm1, %v1683_v5, %v4953_v33  ;;  %v2047_v48 = vmul.f32 %v3269_v37, %v3611_v19  ;;  %v2159_v16 = vrot.slane %v2045_v46, 2 }
 0x16b   : > { %v1528_v30 = vadd.f32 %v1446_v3, %v1284_v14  ;;  %v2289_v27 = vmul.f32 %v3422_v7, %v3600_v2  ;;  %v1763_v54 = vadd.f32 %v1684_v35, %v1527_v4  ;;  %v2290_v47 = vmul.f32 %v3422_v7, %v3607_v56 }
 0x16c   : > { %v2291_v14 = vmul.f32 %v3422_v7, %v3645_v32  ;;  %v2160_v57 = vrot.slane %v2046_v53, 2  ;;  %v2162_v45 = vrot.slane %v2047_v48, 2  ;;  %v1268_v25 = vadd.f32 %v3511_v63, %v3502_v9 }
 0x16d   : > { %v1764_v55 = vadd.f32 %v1686_v40, %v1528_v30  ;;  %v2399_v5 = vrot.slane %v2289_v27, 2  ;;  %v2000_v22 = vadd.f32 %v1918_v51, %v1763_v54  ;;  %v2400_v39 = vrot.slane %v2290_v47, 2  ;;  %v4955_v54 = vld [vmem:[#allocation5_spill] sm:$0xff] }
 0x16e   : > { %v2402_v46 = vrot.slane %v2291_v14, 2  ;;  %v2161_v52 = vsel %vm1873_vm2, %v2159_v16, %v2160_v57  ;;  %v2163_v49 = vsel %vm1873_vm2, %v2160_v57, %v2162_v45  ;;  %v1304_v3 = vmul.f32 %v3258_v31, %v3307_v60  ;;  %v4954_v16 = vld [vmem:[#allocation13_spill] sm:$0xff]  ;;  %v4956_v14 = vld [vmem:[#allocation11_spill] sm:$0xff] }
 0x16f   : > { %v2001_v19 = vadd.f32 %v1920_v26, %v1764_v55  ;;  %v1305_v35 = vmul.f32 %v3258_v31, %v3339_v34  ;;  %v2244_v33 = vadd.f32 %v2161_v52, %v2000_v22  ;;  %v2401_v4 = vsel %vm1873_vm2, %v2399_v5, %v2400_v39 }
 0x170   : > { %v2403_v9 = vsel %vm1873_vm2, %v2400_v39, %v2402_v46  ;;  %v1402_v63 = vrot.slane %v1304_v3, 1  ;;  %v1548_v51 = vmul.f32 %v3275_v43, %v3337_v29  ;;  %v1549_v26 = vmul.f32 %v3275_v43, %v3341_v36  ;;  %v4958_v46 = vld [vmem:[#allocation34_spill] sm:$0xff] }
 0x171   : > { %v2245_v40 = vadd.f32 %v2163_v49, %v2001_v19  ;;  %v1403_v30 = vrot.slane %v1305_v35, 1  ;;  %v2480_v53 = vadd.f32 %v2401_v4, %v2244_v33  ;;  %v1550_v27 = vmul.f32 %v3275_v43, %v4954_v16  ;;  %v4959_v33 = vld [vmem:[#allocation8_spill] sm:$0xff] }
 0x172   : > { %v1782_v55 = vmul.f32 %v3246_v23, %v4955_v54  ;;  %v4957_v57 = vrot.slane %v4956_v14, 1  ;;  %v1642_v5 = vrot.slane %v1548_v51, 1  ;;  %v1643_v22 = vrot.slane %v1549_v26, 1 }
 0x173   : > { %v2481_v48 = vadd.f32 %v2403_v9, %v2245_v40  ;;  %v1404_v47 = vsel %vm1156_vm1, %v1402_v63, %v1403_v30  ;;  %v2512_v19 = vmax.f32 %v2480_v53, 0.0  ;;  %v1645_v35 = vrot.slane %v1550_v27, 1 }
 0x174   : > { %v1406_v45 = vsel %vm1156_vm1, %v1403_v30, %v4957_v57  ;;  %v1511_v52 = vadd.f32 %v1404_v47, %v4958_v46  ;;  %v1644_v3 = vsel %vm1156_vm1, %v1642_v5, %v1643_v22  ;;  %v1783_v40 = vmul.f32 %v3246_v23, %v4959_v33 }
 0x175   : > { %v2513_v39 = vmax.f32 %v2481_v48, 0.0  ;;  %v1512_v49 = vadd.f32 %v1406_v45, %v1268_v25  ;;  %v1876_v4 = vrot.slane %v1782_v55, 2  ;;  %v2544_v9 = vmin.f32 %v2512_v19, 6.0  ;;  %v4960_v25 = vld [vmem:[#allocation9_spill] sm:$0xff]  ;;  %v4961_v45 = vld [vmem:[#allocation7_spill] sm:$0xff] }
 0x176   : > { %v1747_v54 = vadd.f32 %v1644_v3, %v1511_v52  ;;  %v2021_v30 = vmul.f32 %v3269_v37, %v3307_v60  ;;  %v1646_v51 = vsel %vm1156_vm1, %v1643_v22, %v1645_v35  ;;  %v1877_v26 = vrot.slane %v1783_v40, 2 }
 0x177   : > { %v2545_v63 = vmin.f32 %v2513_v39, 6.0  ;;  %v2022_v53 = vmul.f32 %v3269_v37, %v3339_v34  ;;  %v2023_v48 = vmul.f32 %v3269_v37, %v4960_v25  ;;  %v1748_v47 = vadd.f32 %v1646_v51, %v1512_v49 }
 0x178   : > { %v2119_v14 = vrot.slane %v2021_v30, 2  ;;  %v2265_v55 = vmul.f32 %v3422_v7, %v3337_v29  ;;  %v1878_v57 = vsel %vm1873_vm2, %v1876_v4, %v1877_v26  ;;  %v4962_v5 = vrot.slane %v4961_v45, 2 }
 0x179   : > { %v2567_v27 = vpack.c.bf16 %v2545_v63, %v2544_v9  ;;  %v2120_v22 = vrot.slane %v2022_v53, 2  ;;  %v2122_v39 = vrot.slane %v2023_v48, 2  ;;  %v1984_v46 = vadd.f32 %v1878_v57, %v1747_v54  ;;  %v4964_v57 = vld [vmem:[#allocation44_spill] sm:$0xff] }
 0x17a   : > { %v1880_v19 = vsel %vm1873_vm2, %v1877_v26, %v4962_v5  ;;  %v2266_v3 = vmul.f32 %v3422_v7, %v3341_v36  ;;  %v2267_v49 = vmul.f32 %v3422_v7, %v4954_v16  ;;  %v2359_v40 = vrot.slane %v2265_v55, 2  ;;  %v3998_v26 = vld [vmem:[%s4789_s4] ss:$0 sm:$0xff] }
 0x17b   : > { %2926 = vmatprep.subr.msk.bf16.mxu1 %vm2593_vm3, %v2567_v27  ;;  %v1985_v52 = vadd.f32 %v1880_v19, %v1748_v47  ;;  %v2121_v35 = vsel %vm1873_vm2, %v2119_v14, %v2120_v22  ;;  %v2123_v33 = vsel %vm1873_vm2, %v2120_v22, %v2122_v39  ;;  %v875_v4 = vmul.f32 %v3232_v15, %v3577_v21  ;;  %v4963_v14 = vld [vmem:[#allocation53_spill] sm:$0xff] }
 0x17c   : > { %v2228_v9 = vadd.f32 %v2121_v35, %v1984_v46  ;;  %v2360_v30 = vrot.slane %v2266_v3, 2  ;;  %v2362_v51 = vrot.slane %v2267_v49, 2  ;;  %v876_v54 = vmul.f32 %v3232_v15, %v3604_v62 }
 0x17d   : > { %v2229_v63 = vadd.f32 %v2123_v33, %v1985_v52  ;;  %v913_v7 = vadd.f32 %v3998_v26, %v875_v4  ;;  %v949_v53 = vmul.f32 %v3271_v38, %v3600_v2  ;;  %v950_v48 = vmul.f32 %v3271_v38, %v3607_v56 }
 0x17e   : > { %v2361_v27 = vsel %vm1873_vm2, %v2359_v40, %v2360_v30  ;;  %v2363_v47 = vsel %vm1873_vm2, %v2360_v30, %v2362_v51  ;;  %v1017_v55 = vmul.f32 %v3277_v44, %v4963_v14  ;;  %v1018_v45 = vmul.f32 %v3277_v44, %v4964_v57 }
 0x17f   : > { %v2464_v5 = vadd.f32 %v2361_v27, %v2228_v9  ;;  %v2465_v19 = vadd.f32 %v2363_v47, %v2229_v63  ;;  %v914_v22 = vadd.f32 %v3998_v26, %v876_v54  ;;  %v981_v39 = vadd.f32 %v949_v53, %v913_v7 }
 0x180   : > { %v1092_v46 = vmul.f32 %v3239_v18, %v3577_v21  ;;  %v1093_v52 = vmul.f32 %v3239_v18, %v3604_v62  ;;  %v1331_v3 = vmul.f32 %v3258_v31, %v3600_v2  ;;  %v1332_v49 = vmul.f32 %v3258_v31, %v3607_v56 }
 0x181   : > { %v2496_v35 = vmax.f32 %v2464_v5, 0.0  ;;  %v2497_v33 = vmax.f32 %v2465_v19, 0.0  ;;  %v982_v40 = vadd.f32 %v950_v48, %v914_v22  ;;  %v1048_v4 = vadd.f32 %v1017_v55, %v981_v39  ;;  %v4967_v48 = vld [vmem:[#allocation47_spill] sm:$0xff] }
 0x182   : > { %v1204_v9 = vrot.slane %v1092_v46, 1  ;;  %v1205_v63 = vrot.slane %v1093_v52, 1  ;;  %v1447_v30 = vrot.slane %v1331_v3, 1  ;;  %v1448_v51 = vrot.slane %v1332_v49, 1 }
 0x183   : > { %v2528_v54 = vmin.f32 %v2496_v35, 6.0  ;;  %v2529_v7 = vmin.f32 %v2497_v33, 6.0  ;;  %v1049_v53 = vadd.f32 %v1018_v45, %v982_v40  ;;  %v1575_v27 = vmul.f32 %v3275_v43, %v4963_v14 }
 0x184   : > { %v1206_v47 = vsel %vm1156_vm1, %v1204_v9, %v1205_v63  ;;  %v4966_v17 = vrot.slane %v4965_v0, 1  ;;  %v1449_v5 = vsel %vm1156_vm1, %v1447_v30, %v1448_v51  ;;  %v4968_v55 = vrot.slane %v4967_v48, 1 }
 0x185   : > { %v2559_v22 = vpack.c.bf16 %v2529_v7, %v2528_v54  ;;  %v1285_v39 = vadd.f32 %v1206_v47, %v1048_v4  ;;  %v1576_v45 = vmul.f32 %v3275_v43, %v4964_v57  ;;  %v1687_v52 = vrot.slane %v1575_v27, 1 }
 0x186   : > { %v1208_v6 = vsel %vm1156_vm1, %v1205_v63, %v4966_v17  ;;  %v1451_v19 = vsel %vm1156_vm1, %v1448_v51, %v4968_v55  ;;  %v1809_v3 = vmul.f32 %v3246_v23, %v3577_v21  ;;  %v1810_v0 = vmul.f32 %v3246_v23, %v3604_v62  ;;  %v4969_v17 = vld [vmem:[#allocation43_spill] sm:$0xff] }
 0x187   : > { %v1286_v46 = vadd.f32 %v1208_v6, %v1049_v53  ;;  %v1924_v49 = vrot.slane %v4969_v17, 2  ;;  %v2601_v35 = vsel %vm2593_vm3, %v2559_v22, 0  ;;  %v1529_v33 = vadd.f32 %v1449_v5, %v1285_v39  ;;  %v4970_v51 = vld [vmem:[#allocation51_spill] sm:$0xff]  ;;  %v4051_v53 = vld [vmem:[%s4788_s3 + $0x8] ss:$0 sm:$0xff] }
 0x188   : > { %v1688_v9 = vrot.slane %v1576_v45, 1  ;;  %2860 = vmatpush3.bf16.xpose.msra.mxu1 %v2601_v35  ;;  %v1921_v4 = vrot.slane %v1809_v3, 2  ;;  %v1922_v6 = vrot.slane %v1810_v0, 2  ;;  %v2048_v63 = vmul.f32 %v3269_v37, %v3600_v2 }
 0x189   : > { %v1530_v40 = vadd.f32 %v1451_v19, %v1286_v46  ;;  %v2049_v30 = vmul.f32 %v3269_v37, %v3607_v56  ;;  %v4971_v62 = vrot.slane %v4970_v51, 1  ;;  %v2050_v7 = vmul.f32 %v3269_v37, %v3645_v32 }
 0x18a   : > { %v1689_v21 = vsel %vm1156_vm1, %v1687_v52, %v1688_v9  ;;  %v2292_v27 = vmul.f32 %v4051_v53, %v4963_v14  ;;  %v1923_v48 = vsel %vm1873_vm2, %v1921_v4, %v1922_v6  ;;  %v1925_v55 = vsel %vm1873_vm2, %v1922_v6, %v1924_v49  ;;  %v4972_v52 = vld [vmem:[#allocation45_spill] sm:$0xff] }
 0x18b   : > { %v1691_v54 = vsel %vm1156_vm1, %v1688_v9, %v4971_v62  ;;  %v1765_v47 = vadd.f32 %v1689_v21, %v1529_v33  ;;  %v2164_v19 = vrot.slane %v2048_v63, 2  ;;  %v2165_v22 = vrot.slane %v2049_v30, 2 }
 0x18c   : > { %v1766_v5 = vadd.f32 %v1691_v54, %v1530_v40  ;;  %v2167_v39 = vrot.slane %v2050_v7, 2  ;;  %v2293_v32 = vmul.f32 %v4051_v53, %v4964_v57  ;;  %v2294_v3 = vmul.f32 %v4051_v53, %v4972_v52 }
 0x18d   : > { %v2002_v46 = vadd.f32 %v1923_v48, %v1765_v47  ;;  %v2404_v0 = vrot.slane %v2292_v27, 2  ;;  %v2166_v17 = vsel %vm1873_vm2, %v2164_v19, %v2165_v22  ;;  %v859_v49 = vmul.f32 %v3232_v15, %v3307_v60  ;;  %v4973_v27 = vld [vmem:[#allocation17_spill] sm:$0xff] }
 0x18e   : > { %v2003_v45 = vadd.f32 %v1925_v55, %v1766_v5  ;;  %v2168_v35 = vsel %vm1873_vm2, %v2165_v22, %v2167_v39  ;;  %v2405_v33 = vrot.slane %v2293_v32, 2  ;;  %v2407_v4 = vrot.slane %v2294_v3, 2  ;;  %v4974_v55 = vld [vmem:[#allocation12_spill] sm:$0xff] }
 0x18f   : > { %v2246_v40 = vadd.f32 %v2166_v17, %v2002_v46  ;;  %v860_v6 = vmul.f32 %v3232_v15, %v3339_v34  ;;  %v897_v30 = vadd.f32 %v3998_v26, %v859_v49  ;;  %v933_v21 = vmul.f32 %v3271_v38, %v3337_v29 }
 0x190   : > { %v2247_v9 = vadd.f32 %v2168_v35, %v2003_v45  ;;  %v2406_v63 = vsel %vm1873_vm2, %v2404_v0, %v2405_v33  ;;  %v934_v51 = vmul.f32 %v3271_v38, %v3341_v36  ;;  %v2408_v62 = vsel %vm1873_vm2, %v2405_v33, %v2407_v4 }
 0x191   : > { %v2482_v54 = vadd.f32 %v2406_v63, %v2246_v40  ;;  %v898_v7 = vadd.f32 %v3998_v26, %v860_v6  ;;  %v1001_v47 = vmul.f32 %v3277_v44, %v4973_v27  ;;  %v965_v48 = vadd.f32 %v933_v21, %v897_v30 }
 0x192   : > { %v2483_v5 = vadd.f32 %v2408_v62, %v2247_v9  ;;  %v1002_v19 = vmul.f32 %v3277_v44, %v4974_v55  ;;  %v1068_v22 = vmul.f32 %v3239_v18, %v3307_v60  ;;  %v1069_v46 = vmul.f32 %v3239_v18, %v3339_v34 }
 0x193   : > { %v2514_v39 = vmax.f32 %v2482_v54, 0.0  ;;  %v966_v32 = vadd.f32 %v934_v51, %v898_v7  ;;  %v1307_v45 = vmul.f32 %v3258_v31, %v3337_v29  ;;  %v1032_v0 = vadd.f32 %v1001_v47, %v965_v48  ;;  %v4975_v51 = vld [vmem:[#allocation10_spill] sm:$0xff] }
 0x194   : > { %v2515_v3 = vmax.f32 %v2483_v5, 0.0  ;;  %v1164_v17 = vrot.slane %v1068_v22, 1  ;;  %v1308_v35 = vmul.f32 %v3258_v31, %v3341_v36  ;;  %v1165_v40 = vrot.slane %v1069_v46, 1  ;;  %v4977_v7 = vld [vmem:[#allocation14_spill] sm:$0xff] }
 0x195   : > { %v2546_v33 = vmin.f32 %v2514_v39, 6.0  ;;  %v1033_v49 = vadd.f32 %v1002_v19, %v966_v32  ;;  %v1407_v9 = vrot.slane %v1307_v45, 1  ;;  %v1551_v63 = vmul.f32 %v3275_v43, %v4973_v27  ;;  %v4978_v32 = vld [vmem:[#allocation16_spill] sm:$0xff] }
 0x196   : > { %v2547_v4 = vmin.f32 %v2515_v3, 6.0  ;;  %v1408_v6 = vrot.slane %v1308_v35, 1  ;;  %v1552_v30 = vmul.f32 %v3275_v43, %v4974_v55  ;;  %v1166_v21 = vsel %vm1156_vm1, %v1164_v17, %v1165_v40 }
 0x197   : > { %v4976_v62 = vrot.slane %v4975_v51, 1  ;;  %v1553_v47 = vmul.f32 %v3275_v43, %v4977_v7  ;;  %v1785_v5 = vmul.f32 %v3246_v23, %v3307_v60  ;;  %v1269_v19 = vadd.f32 %v1166_v21, %v1032_v0 }
 0x198   : > { %v2568_v48 = vpack.c.bf16 %v2547_v4, %v2546_v33  ;;  %v1409_v39 = vsel %vm1156_vm1, %v1407_v9, %v1408_v6  ;;  %v4979_v46 = vrot.slane %v4978_v32, 1  ;;  %v1647_v3 = vrot.slane %v1551_v63, 1 }
 0x199   : > { %v1168_v54 = vsel %vm1156_vm1, %v1165_v40, %v4976_v62  ;;  %v1648_v17 = vrot.slane %v1552_v30, 1  ;;  %v1650_v35 = vrot.slane %v1553_v47, 1  ;;  %v1513_v40 = vadd.f32 %v1409_v39, %v1269_v19 }
 0x19a   : > { %v1270_v22 = vadd.f32 %v1168_v54, %v1033_v49  ;;  %v1411_v45 = vsel %vm1156_vm1, %v1408_v6, %v4979_v46  ;;  %2927 = vmatprep.subr.msk.bf16.mxu1 %vm2593_vm3, %v2568_v48  ;;  %v1786_v62 = vmul.f32 %v3246_v23, %v3339_v34  ;;  %v1787_v60 = vmul.f32 %v3246_v23, %v4960_v25 }
 0x19b   : > { %v1649_v0 = vsel %vm1156_vm1, %v1647_v3, %v1648_v17  ;;  %v1651_v33 = vsel %vm1156_vm1, %v1648_v17, %v1650_v35  ;;  %v1881_v49 = vrot.slane %v1785_v5, 2  ;;  %v2024_v9 = vmul.f32 %v3269_v37, %v3337_v29 }
 0x19c   : > { %v1514_v51 = vadd.f32 %v1411_v45, %v1270_v22  ;;  %v1749_v4 = vadd.f32 %v1649_v0, %v1513_v40  ;;  %v1882_v63 = vrot.slane %v1786_v62, 2  ;;  %v1884_v30 = vrot.slane %v1787_v60, 2 }
 0x19d   : > { %v2025_v21 = vmul.f32 %v3269_v37, %v3341_v36  ;;  %v2026_v34 = vmul.f32 %v3269_v37, %v4954_v16  ;;  %v2124_v54 = vrot.slane %v2024_v9, 2  ;;  %v2268_v25 = vmul.f32 %v4051_v53, %v4973_v27 }
 0x19e   : > { %v1750_v6 = vadd.f32 %v1651_v33, %v1514_v51  ;;  %v1883_v47 = vsel %vm1873_vm2, %v1881_v49, %v1882_v63  ;;  %v1885_v5 = vsel %vm1873_vm2, %v1882_v63, %v1884_v30  ;;  %v2269_v48 = vmul.f32 %v4051_v53, %v4974_v55  ;;  %v4980_v30 = vld [vmem:[#allocation55_spill] sm:$0xff] }
 0x19f   : > { %v2270_v19 = vmul.f32 %v4051_v53, %v4977_v7  ;;  %v1986_v22 = vadd.f32 %v1883_v47, %v1749_v4  ;;  %v2125_v32 = vrot.slane %v2025_v21, 2  ;;  %v2127_v46 = vrot.slane %v2026_v34, 2 }
 0x1a0   : > { %v1987_v39 = vadd.f32 %v1885_v5, %v1750_v6  ;;  %v2364_v45 = vrot.slane %v2268_v25, 2  ;;  %v2365_v3 = vrot.slane %v2269_v48, 2  ;;  %v877_v35 = vmul.f32 %v3232_v15, %v3600_v2  ;;  %v4981_v25 = vld [vmem:[#allocation57_spill] sm:$0xff] }
 0x1a1   : > { %v2367_v17 = vrot.slane %v2270_v19, 2  ;;  %v2126_v40 = vsel %vm1873_vm2, %v2124_v54, %v2125_v32  ;;  %v2128_v51 = vsel %vm1873_vm2, %v2125_v32, %v2127_v46  ;;  %v878_v62 = vmul.f32 %v3232_v15, %v3607_v56 }
 0x1a2   : > { %v951_v60 = vmul.f32 %v3271_v38, %v4963_v14  ;;  %v2230_v0 = vadd.f32 %v2126_v40, %v1986_v22  ;;  %v2231_v33 = vadd.f32 %v2128_v51, %v1987_v39  ;;  %v2366_v49 = vsel %vm1873_vm2, %v2364_v45, %v2365_v3 }
 0x1a3   : > { %v2368_v9 = vsel %vm1873_vm2, %v2365_v3, %v2367_v17  ;;  %v915_v4 = vadd.f32 %v3998_v26, %v877_v35  ;;  %v916_v6 = vadd.f32 %v3998_v26, %v878_v62  ;;  %v952_v63 = vmul.f32 %v3271_v38, %v4964_v57 }
 0x1a4   : > { %v1019_v21 = vmul.f32 %v3277_v44, %v4980_v30  ;;  %v2466_v34 = vadd.f32 %v2366_v49, %v2230_v0  ;;  %v2467_v54 = vadd.f32 %v2368_v9, %v2231_v33  ;;  %v1020_v47 = vmul.f32 %v3277_v44, %v4981_v25  ;;  %v4982_v9 = vld [vmem:[#allocation46_spill] sm:$0xff] }
 0x1a5   : > { %v1095_v5 = vmul.f32 %v3239_v18, %v3600_v2  ;;  %v983_v48 = vadd.f32 %v951_v60, %v915_v4  ;;  %v984_v19 = vadd.f32 %v952_v63, %v916_v6  ;;  %v1096_v22 = vmul.f32 %v3239_v18, %v3607_v56 }
 0x1a6   : > { %v1334_v39 = vmul.f32 %v3258_v31, %v4963_v14  ;;  %v2498_v32 = vmax.f32 %v2466_v34, 0.0  ;;  %v2499_v46 = vmax.f32 %v2467_v54, 0.0  ;;  %v1335_v3 = vmul.f32 %v3258_v31, %v4964_v57 }
 0x1a7   : > { %v1209_v45 = vrot.slane %v1095_v5, 1  ;;  %v1050_v17 = vadd.f32 %v1019_v21, %v983_v48  ;;  %v1051_v35 = vadd.f32 %v1020_v47, %v984_v19  ;;  %v1210_v40 = vrot.slane %v1096_v22, 1  ;;  %v4984_v48 = vld [vmem:[#allocation50_spill] sm:$0xff] }
 0x1a8   : > { %v1452_v51 = vrot.slane %v1334_v39, 1  ;;  %v2530_v62 = vmin.f32 %v2498_v32, 6.0  ;;  %v2531_v0 = vmin.f32 %v2499_v46, 6.0  ;;  %v1453_v60 = vrot.slane %v1335_v3, 1 }
 0x1a9   : > { %v1578_v33 = vmul.f32 %v3275_v43, %v4980_v30  ;;  %v1211_v49 = vsel %vm1156_vm1, %v1209_v45, %v1210_v40  ;;  %v4983_v4 = vrot.slane %v4982_v9, 1  ;;  %v1579_v63 = vmul.f32 %v3275_v43, %v4981_v25 }
 0x1aa   : > { %v1812_v21 = vmul.f32 %v3246_v23, %v3600_v2  ;;  %v2560_v34 = vpack.c.bf16 %v2531_v0, %v2530_v62  ;;  %v1287_v54 = vadd.f32 %v1211_v49, %v1050_v17  ;;  %v1454_v5 = vsel %vm1156_vm1, %v1452_v51, %v1453_v60  ;;  %v4986_v17 = vld [vmem:[#allocation60_spill] sm:$0xff] }
 0x1ab   : > { %v1213_v6 = vsel %vm1156_vm1, %v1210_v40, %v4983_v4  ;;  %v4985_v19 = vrot.slane %v4984_v48, 1  ;;  %v1692_v39 = vrot.slane %v1578_v33, 1  ;;  %v1693_v32 = vrot.slane %v1579_v63, 1  ;;  %v4988_v0 = vld [vmem:[#allocation48_spill] sm:$0xff] }
 0x1ac   : > { %v1288_v47 = vadd.f32 %v1213_v6, %v1051_v35  ;;  %v1813_v46 = vmul.f32 %v3246_v23, %v3607_v56  ;;  %v2604_v45 = vsel %vm2593_vm3, %v2560_v34, 0  ;;  %v1531_v3 = vadd.f32 %v1454_v5, %v1287_v54 }
 0x1ad   : > { %v1456_v22 = vsel %vm1156_vm1, %v1453_v60, %v4985_v19  ;;  %v1926_v9 = vrot.slane %v1812_v21, 2  ;;  %2862 = vmatpush3.bf16.xpose.msra.mxu1 %v2604_v45  ;;  %v1694_v2 = vsel %vm1156_vm1, %v1692_v39, %v1693_v32  ;;  %v4987_v35 = vrot.slane %v4986_v17, 1  ;;  %v4989_v39 = vld [vmem:[#allocation54_spill] sm:$0xff] }
 0x1ae   : > { %v1532_v40 = vadd.f32 %v1456_v22, %v1288_v47  ;;  %v1927_v62 = vrot.slane %v1813_v46, 2  ;;  %v1929_v60 = vrot.slane %v4988_v0, 2  ;;  %v1767_v33 = vadd.f32 %v1694_v2, %v1531_v3 }
 0x1af   : > { %v1696_v51 = vsel %vm1156_vm1, %v1693_v32, %v4987_v35  ;;  %v2051_v56 = vmul.f32 %v3269_v37, %v4963_v14  ;;  %v2052_v4 = vmul.f32 %v3269_v37, %v4964_v57  ;;  %v2053_v21 = vmul.f32 %v3269_v37, %v4972_v52 }
 0x1b0   : > { %v1768_v49 = vadd.f32 %v1696_v51, %v1532_v40  ;;  %v1928_v6 = vsel %vm1873_vm2, %v1926_v9, %v1927_v62  ;;  %v1930_v63 = vsel %vm1873_vm2, %v1927_v62, %v1929_v60  ;;  %v2295_v34 = vmul.f32 %v4051_v53, %v4980_v30 }
 0x1b1   : > { %v2004_v54 = vadd.f32 %v1928_v6, %v1767_v33  ;;  %v2169_v5 = vrot.slane %v2051_v56, 2  ;;  %v2170_v48 = vrot.slane %v2052_v4, 2  ;;  %v2172_v19 = vrot.slane %v2053_v21, 2  ;;  %v4990_v56 = vld [vmem:[#allocation21_spill] sm:$0xff] }
 0x1b2   : > { %v2005_v47 = vadd.f32 %v1930_v63, %v1768_v49  ;;  %v2296_v22 = vmul.f32 %v4051_v53, %v4981_v25  ;;  %v2297_v32 = vmul.f32 %v4051_v53, %v4989_v39  ;;  %v2409_v46 = vrot.slane %v2295_v34, 2  ;;  %v4991_v6 = vld [vmem:[#allocation25_spill] sm:$0xff] }
 0x1b3   : > { %v2171_v45 = vsel %vm1873_vm2, %v2169_v5, %v2170_v48  ;;  %v861_v52 = vmul.f32 %v3232_v15, %v3337_v29  ;;  %v862_v3 = vmul.f32 %v3232_v15, %v3341_v36  ;;  %v935_v40 = vmul.f32 %v3271_v38, %v4973_v27 }
 0x1b4   : > { %v2173_v9 = vsel %vm1873_vm2, %v2170_v48, %v2172_v19  ;;  %v2248_v2 = vadd.f32 %v2171_v45, %v2004_v54  ;;  %v2410_v17 = vrot.slane %v2296_v22, 2  ;;  %v2412_v35 = vrot.slane %v2297_v32, 2 }
 0x1b5   : > { %v2249_v51 = vadd.f32 %v2173_v9, %v2005_v47  ;;  %v899_v62 = vadd.f32 %v3998_v26, %v861_v52  ;;  %v900_v0 = vadd.f32 %v3998_v26, %v862_v3  ;;  %v936_v60 = vmul.f32 %v3271_v38, %v4974_v55 }
 0x1b6   : > { %v2411_v33 = vsel %vm1873_vm2, %v2409_v46, %v2410_v17  ;;  %v2413_v49 = vsel %vm1873_vm2, %v2410_v17, %v2412_v35  ;;  %v1003_v4 = vmul.f32 %v3277_v44, %v4990_v56  ;;  %v1004_v63 = vmul.f32 %v3277_v44, %v4991_v6 }
 0x1b7   : > { %v2484_v21 = vadd.f32 %v2411_v33, %v2248_v2  ;;  %v2485_v34 = vadd.f32 %v2413_v49, %v2249_v51  ;;  %v967_v54 = vadd.f32 %v935_v40, %v899_v62  ;;  %v968_v47 = vadd.f32 %v936_v60, %v900_v0  ;;  %v4992_v60 = vld [vmem:[#allocation15_spill] sm:$0xff] }
 0x1b8   : > { %v1071_v5 = vmul.f32 %v3239_v18, %v3337_v29  ;;  %v1072_v48 = vmul.f32 %v3239_v18, %v3341_v36  ;;  %v1310_v19 = vmul.f32 %v3258_v31, %v4973_v27  ;;  %v1311_v22 = vmul.f32 %v3258_v31, %v4974_v55 }
 0x1b9   : > { %v2516_v32 = vmax.f32 %v2484_v21, 0.0  ;;  %v2517_v46 = vmax.f32 %v2485_v34, 0.0  ;;  %v1034_v45 = vadd.f32 %v1003_v4, %v967_v54  ;;  %v1035_v52 = vadd.f32 %v1004_v63, %v968_v47  ;;  %v4994_v63 = vld [vmem:[#allocation19_spill] sm:$0xff] }
 0x1ba   : > { %v1169_v3 = vrot.slane %v1071_v5, 1  ;;  %v1170_v9 = vrot.slane %v1072_v48, 1  ;;  %v1412_v40 = vrot.slane %v1310_v19, 1  ;;  %v1413_v2 = vrot.slane %v1311_v22, 1  ;;  %v4996_v48 = vld [vmem:[#allocation20_spill] sm:$0xff] }
 0x1bb   : > { %v2548_v17 = vmin.f32 %v2516_v32, 6.0  ;;  %v2549_v35 = vmin.f32 %v2517_v46, 6.0  ;;  %v1554_v51 = vmul.f32 %v3275_v43, %v4990_v56  ;;  %v1555_v62 = vmul.f32 %v3275_v43, %v4991_v6 }
 0x1bc   : > { %v1171_v0 = vsel %vm1156_vm1, %v1169_v3, %v1170_v9  ;;  %v4993_v33 = vrot.slane %v4992_v60, 1  ;;  %v1414_v4 = vsel %vm1156_vm1, %v1412_v40, %v1413_v2  ;;  %v4995_v21 = vrot.slane %v4994_v63, 1 }
 0x1bd   : > { %v2569_v54 = vpack.c.bf16 %v2549_v35, %v2548_v17  ;;  %v1271_v47 = vadd.f32 %v1171_v0, %v1034_v45  ;;  %v1556_v19 = vmul.f32 %v3275_v43, %v4996_v48  ;;  %v1652_v22 = vrot.slane %v1554_v51, 1 }
 0x1be   : > { %v1173_v49 = vsel %vm1156_vm1, %v1170_v9, %v4993_v33  ;;  %v1416_v34 = vsel %vm1156_vm1, %v1413_v2, %v4995_v21  ;;  %v1653_v32 = vrot.slane %v1555_v62, 1  ;;  %v1788_v46 = vmul.f32 %v3246_v23, %v3337_v29 }
 0x1bf   : > { %v1272_v5 = vadd.f32 %v1173_v49, %v1035_v52  ;;  %v1789_v3 = vmul.f32 %v3246_v23, %v3341_v36  ;;  %2928 = vmatprep.subr.msk.bf16.mxu1 %vm2593_vm3, %v2569_v54  ;;  %v1515_v9 = vadd.f32 %v1414_v4, %v1271_v47  ;;  %v1655_v60 = vrot.slane %v1556_v19, 1 }
 0x1c0   : > { %v1790_v45 = vmul.f32 %v3246_v23, %v4954_v16  ;;  %v1654_v52 = vsel %vm1156_vm1, %v1652_v22, %v1653_v32  ;;  %v1886_v2 = vrot.slane %v1788_v46, 2  ;;  %v2027_v35 = vmul.f32 %v3269_v37, %v4973_v27 }
 0x1c1   : > { %v1516_v40 = vadd.f32 %v1416_v34, %v1272_v5  ;;  %v1887_v17 = vrot.slane %v1789_v3, 2  ;;  %v1656_v29 = vsel %vm1156_vm1, %v1653_v32, %v1655_v60  ;;  %v1751_v51 = vadd.f32 %v1654_v52, %v1515_v9 }
 0x1c2   : > { %v1889_v62 = vrot.slane %v1790_v45, 2  ;;  %v2028_v36 = vmul.f32 %v3269_v37, %v4974_v55  ;;  %v2029_v16 = vmul.f32 %v3269_v37, %v4977_v7  ;;  %v2129_v49 = vrot.slane %v2027_v35, 2 }
 0x1c3   : > { %v1752_v0 = vadd.f32 %v1656_v29, %v1516_v40  ;;  %v1888_v33 = vsel %vm1873_vm2, %v1886_v2, %v1887_v17  ;;  %v2271_v34 = vmul.f32 %v4051_v53, %v4990_v56  ;;  %v2272_v5 = vmul.f32 %v4051_v53, %v4991_v6 }
 0x1c4   : > { %v1890_v4 = vsel %vm1873_vm2, %v1887_v17, %v1889_v62  ;;  %v1988_v63 = vadd.f32 %v1888_v33, %v1751_v51  ;;  %v2130_v21 = vrot.slane %v2028_v36, 2  ;;  %v2132_v47 = vrot.slane %v2029_v16, 2  ;;  %v4997_v36 = vld [vmem:[#allocation56_spill] sm:$0xff] }
 0x1c5   : > { %v1989_v54 = vadd.f32 %v1890_v4, %v1752_v0  ;;  %v2273_v19 = vmul.f32 %v4051_v53, %v4996_v48  ;;  %v2369_v32 = vrot.slane %v2271_v34, 2  ;;  %v879_v46 = vmul.f32 %v3232_v15, %v4963_v14  ;;  %v4998_v4 = vld [vmem:[#allocation62_spill] sm:$0xff] }
 0x1c6   : > { %v2131_v22 = vsel %vm1873_vm2, %v2129_v49, %v2130_v21  ;;  %v880_v3 = vmul.f32 %v3232_v15, %v4964_v57  ;;  %v2133_v9 = vsel %vm1873_vm2, %v2130_v21, %v2132_v47  ;;  %v2370_v60 = vrot.slane %v2272_v5, 2 }
 0x1c7   : > { %v2232_v40 = vadd.f32 %v2131_v22, %v1988_v63  ;;  %v2372_v45 = vrot.slane %v2273_v19, 2  ;;  %v2233_v52 = vadd.f32 %v2133_v9, %v1989_v54  ;;  %v917_v2 = vadd.f32 %v3998_v26, %v879_v46 }
 0x1c8   : > { %v918_v17 = vadd.f32 %v3998_v26, %v880_v3  ;;  %v953_v35 = vmul.f32 %v3271_v38, %v4980_v30  ;;  %v2371_v29 = vsel %vm1873_vm2, %v2369_v32, %v2370_v60  ;;  %v954_v62 = vmul.f32 %v3271_v38, %v4981_v25 }
 0x1c9   : > { %v2373_v51 = vsel %vm1873_vm2, %v2370_v60, %v2372_v45  ;;  %v1021_v0 = vmul.f32 %v3277_v44, %v4997_v36  ;;  %v2468_v33 = vadd.f32 %v2371_v29, %v2232_v40  ;;  %v1022_v63 = vmul.f32 %v3277_v44, %v4998_v4 }
 0x1ca   : > { %v2469_v16 = vadd.f32 %v2373_v51, %v2233_v52  ;;  %v985_v49 = vadd.f32 %v953_v35, %v917_v2  ;;  %v986_v21 = vadd.f32 %v954_v62, %v918_v17  ;;  %v1098_v34 = vmul.f32 %v3239_v18, %v4963_v14  ;;  %v4999_v35 = vld [vmem:[#allocation49_spill] sm:$0xff] }
 0x1cb   : > { %v1099_v54 = vmul.f32 %v3239_v18, %v4964_v57  ;;  %v1337_v47 = vmul.f32 %v3258_v31, %v4980_v30  ;;  %v2500_v5 = vmax.f32 %v2468_v33, 0.0  ;;  %v1338_v32 = vmul.f32 %v3258_v31, %v4981_v25 }
 0x1cc   : > { %v2501_v19 = vmax.f32 %v2469_v16, 0.0  ;;  %v1052_v22 = vadd.f32 %v1021_v0, %v985_v49  ;;  %v1053_v46 = vadd.f32 %v1022_v63, %v986_v21  ;;  %v1214_v3 = vrot.slane %v1098_v34, 1  ;;  %v5001_v21 = vld [vmem:[#allocation59_spill] sm:$0xff] }
 0x1cd   : > { %v1215_v9 = vrot.slane %v1099_v54, 1  ;;  %v1457_v40 = vrot.slane %v1337_v47, 1  ;;  %v2532_v60 = vmin.f32 %v2500_v5, 6.0  ;;  %v1458_v52 = vrot.slane %v1338_v32, 1 }
 0x1ce   : > { %v2533_v45 = vmin.f32 %v2501_v19, 6.0  ;;  %v1581_v2 = vmul.f32 %v3275_v43, %v4997_v36  ;;  %v5000_v29 = vrot.slane %v4999_v35, 1  ;;  %v1582_v62 = vmul.f32 %v3275_v43, %v4998_v4 }
 0x1cf   : > { %v1216_v17 = vsel %vm1156_vm1, %v1214_v3, %v1215_v9  ;;  %v1815_v0 = vmul.f32 %v3246_v23, %v4963_v14  ;;  %v1459_v63 = vsel %vm1156_vm1, %v1457_v40, %v1458_v52  ;;  %v5002_v34 = vrot.slane %v5001_v21, 1 }
 0x1d0   : > { %v1218_v51 = vsel %vm1156_vm1, %v1215_v9, %v5000_v29  ;;  %v2561_v33 = vpack.c.bf16 %v2533_v45, %v2532_v60  ;;  %v1289_v16 = vadd.f32 %v1216_v17, %v1052_v22  ;;  %v1697_v47 = vrot.slane %v1581_v2, 1  ;;  %v5004_v60 = vld [vmem:[#allocation52_spill] sm:$0xff]  ;;  %v4304_v29 = vld [vmem:[%s4790_s5] sm:$0xff]  }
 0x1d1   : > { %v1290_v49 = vadd.f32 %v1218_v51, %v1053_v46  ;;  %v1461_v54 = vsel %vm1156_vm1, %v1458_v52, %v5002_v34  ;;  %v1698_v5 = vrot.slane %v1582_v62, 1  ;;  %v1816_v19 = vmul.f32 %v3246_v23, %v4964_v57  ;;  %2873 = vmatprep.mubr.msk.bf16.mxu1 %vm2593_vm3, %v4304_v29 }
 0x1d2   : > { %v2607_v32 = vsel %vm2593_vm3, %v2561_v33, 0  ;;  %v1533_v3 = vadd.f32 %v1459_v63, %v1289_v16  ;;  %v1931_v35 = vrot.slane %v1815_v0, 2  ;;  %v5003_v22 = vrot.slane %v3772_v41, 1 }
 0x1d3   : > { %v1534_v9 = vadd.f32 %v1461_v54, %v1290_v49  ;;  %2864 = vmatpush3.bf16.xpose.msra.mxu1 %v2607_v32  ;;  %v1699_v14 = vsel %vm1156_vm1, %v1697_v47, %v1698_v5  ;;  %v1932_v40 = vrot.slane %v1816_v19, 2  ;;  %v1934_v45 = vrot.slane %v5004_v60, 2  ;;  %v5005_v54 = vld [vmem:[#allocation63_spill] sm:$0xff] }
 0x1d4   : > { %v1701_v46 = vsel %vm1156_vm1, %v1698_v5, %v5003_v22  ;;  %v1769_v52 = vadd.f32 %v1699_v14, %v1533_v3  ;;  %v2054_v57 = vmul.f32 %v3269_v37, %v4980_v30  ;;  %v2055_v17 = vmul.f32 %v3269_v37, %v4981_v25 }
 0x1d5   : > { %v1770_v2 = vadd.f32 %v1701_v46, %v1534_v9  ;;  %v1933_v41 = vsel %vm1873_vm2, %v1931_v35, %v1932_v40  ;;  %v1935_v51 = vsel %vm1873_vm2, %v1932_v40, %v1934_v45  ;;  %v2056_v62 = vmul.f32 %v3269_v37, %v4989_v39 }
 0x1d6   : > { %v2298_v0 = vmul.f32 %v4051_v53, %v4997_v36  ;;  %v2006_v33 = vadd.f32 %v1933_v41, %v1769_v52  ;;  %v2174_v49 = vrot.slane %v2054_v57, 2  ;;  %v2175_v63 = vrot.slane %v2055_v17, 2  ;;  %v5006_v57 = vld [vmem:[#allocation24_spill] sm:$0xff]  ;;  %v5007_v41 = vld [vmem:[#allocation27_spill] sm:$0xff] }
 0x1d7   : > { %v2007_v16 = vadd.f32 %v1935_v51, %v1770_v2  ;;  %v2177_v21 = vrot.slane %v2056_v62, 2  ;;  %v2299_v34 = vmul.f32 %v4051_v53, %v4998_v4  ;;  %v2300_v47 = vmul.f32 %v4051_v53, %v5005_v54 }
 0x1d8   : > { %v2414_v5 = vrot.slane %v2298_v0, 2  ;;  %v2176_v39 = vsel %vm1873_vm2, %v2174_v49, %v2175_v63  ;;  %v863_v19 = vmul.f32 %v3232_v15, %v4973_v27  ;;  %v864_v32 = vmul.f32 %v3232_v15, %v4974_v55 }
 0x1d9   : > { %v937_v3 = vmul.f32 %v3271_v38, %v4990_v56  ;;  %v2178_v9 = vsel %vm1873_vm2, %v2175_v63, %v2177_v21  ;;  %v2250_v35 = vadd.f32 %v2176_v39, %v2006_v33  ;;  %v2415_v14 = vrot.slane %v2299_v34, 2 }
 0x1da   : > { %v2417_v22 = vrot.slane %v2300_v47, 2  ;;  %v2251_v46 = vadd.f32 %v2178_v9, %v2007_v16  ;;  %v901_v40 = vadd.f32 %v3998_v26, %v863_v19  ;;  %v902_v60 = vadd.f32 %v3998_v26, %v864_v32 }
 0x1db   : > { %v938_v45 = vmul.f32 %v3271_v38, %v4991_v6  ;;  %v2416_v52 = vsel %vm1873_vm2, %v2414_v5, %v2415_v14  ;;  %v1005_v17 = vmul.f32 %v3277_v44, %v5006_v57  ;;  %v1006_v51 = vmul.f32 %v3277_v44, %v5007_v41 }
 0x1dc   : > { %v2418_v2 = vsel %vm1873_vm2, %v2415_v14, %v2417_v22  ;;  %v2486_v62 = vadd.f32 %v2416_v52, %v2250_v35  ;;  %v969_v33 = vadd.f32 %v937_v3, %v901_v40  ;;  %v1074_v49 = vmul.f32 %v3239_v18, %v4973_v27 }
 0x1dd   : > { %v2487_v0 = vadd.f32 %v2418_v2, %v2251_v46  ;;  %v970_v16 = vadd.f32 %v938_v45, %v902_v60  ;;  %v1075_v63 = vmul.f32 %v3239_v18, %v4974_v55  ;;  %v1313_v21 = vmul.f32 %v3258_v31, %v4990_v56  ;;  %v5008_v45 = vld [vmem:[#allocation18_spill] sm:$0xff] }
 0x1de   : > { %v1314_v34 = vmul.f32 %v3258_v31, %v4991_v6  ;;  %v2518_v47 = vmax.f32 %v2486_v62, 0.0  ;;  %v1036_v39 = vadd.f32 %v1005_v17, %v969_v33  ;;  %v1174_v32 = vrot.slane %v1074_v49, 1 }
 0x1df   : > { %v2519_v5 = vmax.f32 %v2487_v0, 0.0  ;;  %v1037_v19 = vadd.f32 %v1006_v51, %v970_v16  ;;  %v1175_v9 = vrot.slane %v1075_v63, 1  ;;  %v1417_v3 = vrot.slane %v1313_v21, 1  ;;  %v5010_v51 = vld [vmem:[#allocation23_spill] sm:$0xff]  ;;  %v5012_v63 = vld [vmem:[#allocation29_spill] sm:$0xff] }
 0x1e0   : > { %v1418_v35 = vrot.slane %v1314_v34, 1  ;;  %v2550_v14 = vmin.f32 %v2518_v47, 6.0  ;;  %v1557_v46 = vmul.f32 %v3275_v43, %v5006_v57  ;;  %v1558_v40 = vmul.f32 %v3275_v43, %v5007_v41 }
 0x1e1   : > { %v2551_v22 = vmin.f32 %v2519_v5, 6.0  ;;  %v1176_v60 = vsel %vm1156_vm1, %v1174_v32, %v1175_v9  ;;  %v5009_v52 = vrot.slane %v5008_v45, 1  ;;  %v5011_v62 = vrot.slane %v5010_v51, 1 }
 0x1e2   : > { %v1419_v17 = vsel %vm1156_vm1, %v1417_v3, %v1418_v35  ;;  %v1273_v16 = vadd.f32 %v1176_v60, %v1036_v39  ;;  %v1559_v21 = vmul.f32 %v3275_v43, %v5012_v63  ;;  %v1657_v34 = vrot.slane %v1557_v46, 1 }
 0x1e3   : > { %v1178_v2 = vsel %vm1156_vm1, %v1175_v9, %v5009_v52  ;;  %v1421_v0 = vsel %vm1156_vm1, %v1418_v35, %v5011_v62  ;;  %v2570_v33 = vpack.c.bf16 %v2551_v22, %v2550_v14  ;;  %v1658_v47 = vrot.slane %v1558_v40, 1 }
 0x1e4   : > { %v1274_v49 = vadd.f32 %v1178_v2, %v1037_v19  ;;  %v1791_v5 = vmul.f32 %v3246_v23, %v4973_v27  ;;  %v1792_v32 = vmul.f32 %v3246_v23, %v4974_v55  ;;  %v1517_v9 = vadd.f32 %v1419_v17, %v1273_v16 }
 0x1e5   : > { %2929 = vmatprep.subr.msk.bf16.mxu1 %vm2593_vm3, %v2570_v33  ;;  %v1660_v45 = vrot.slane %v1559_v21, 1  ;;  %v1793_v39 = vmul.f32 %v3246_v23, %v4977_v7  ;;  %v1659_v19 = vsel %vm1156_vm1, %v1657_v34, %v1658_v47  ;;  %v2030_v22 = vmul.f32 %v3269_v37, %v4990_v56 }
 0x1e6   : > { %v1518_v3 = vadd.f32 %v1421_v0, %v1274_v49  ;;  %v1891_v35 = vrot.slane %v1791_v5, 2  ;;  %v1892_v14 = vrot.slane %v1792_v32, 2  ;;  %v1753_v46 = vadd.f32 %v1659_v19, %v1517_v9 }
 0x1e7   : > { %v1661_v27 = vsel %vm1156_vm1, %v1658_v47, %v1660_v45  ;;  %v1894_v40 = vrot.slane %v1793_v39, 2  ;;  %v2031_v55 = vmul.f32 %v3269_v37, %v4991_v6  ;;  %v2032_v7 = vmul.f32 %v3269_v37, %v4996_v48 }
 0x1e8   : > { %v1754_v60 = vadd.f32 %v1661_v27, %v1518_v3  ;;  %v1893_v52 = vsel %vm1873_vm2, %v1891_v35, %v1892_v14  ;;  %v2134_v2 = vrot.slane %v2030_v22, 2  ;;  %v2274_v0 = vmul.f32 %v4051_v53, %v5006_v57 }
 0x1e9   : > { %v1895_v17 = vsel %vm1873_vm2, %v1892_v14, %v1894_v40  ;;  %v1990_v51 = vadd.f32 %v1893_v52, %v1753_v46  ;;  %v2135_v62 = vrot.slane %v2031_v55, 2  ;;  %v2137_v16 = vrot.slane %v2032_v7, 2 }
 0x1ea   : > { %v1991_v33 = vadd.f32 %v1895_v17, %v1754_v60  ;;  %v2275_v49 = vmul.f32 %v4051_v53, %v5007_v41  ;;  %v2276_v21 = vmul.f32 %v4051_v53, %v5012_v63  ;;  %v2374_v47 = vrot.slane %v2274_v0, 2 }
 0x1eb   : > { %v2136_v34 = vsel %vm1873_vm2, %v2134_v2, %v2135_v62  ;;  %v881_v5 = vmul.f32 %v3232_v15, %v4980_v30  ;;  %v882_v32 = vmul.f32 %v3232_v15, %v4981_v25  ;;  %v2138_v9 = vsel %vm1873_vm2, %v2135_v62, %v2137_v16 }
 0x1ec   : > { %v2234_v3 = vadd.f32 %v2136_v34, %v1990_v51  ;;  %v2375_v45 = vrot.slane %v2275_v49, 2  ;;  %v2377_v39 = vrot.slane %v2276_v21, 2  ;;  %v2235_v19 = vadd.f32 %v2138_v9, %v1991_v33 }
 0x1ed   : > { %v919_v35 = vadd.f32 %v3998_v26, %v881_v5  ;;  %v920_v14 = vadd.f32 %v3998_v26, %v882_v32  ;;  %v955_v22 = vmul.f32 %v3271_v38, %v4997_v36  ;;  %v956_v40 = vmul.f32 %v3271_v38, %v4998_v4 }
 0x1ee   : > { %v2376_v27 = vsel %vm1873_vm2, %v2374_v47, %v2375_v45  ;;  %v2378_v46 = vsel %vm1873_vm2, %v2375_v45, %v2377_v39  ;;  %v1023_v55 = vmul.f32 %v3277_v44, %v3737_v10  ;;  %v1024_v2 = vmul.f32 %v3277_v44, %v3743_v8 }
 0x1ef   : > { %v2470_v60 = vadd.f32 %v2376_v27, %v2234_v3  ;;  %v2471_v52 = vadd.f32 %v2378_v46, %v2235_v19  ;;  %v987_v7 = vadd.f32 %v955_v22, %v919_v35  ;;  %v988_v26 = vadd.f32 %v956_v40, %v920_v14  ;;  %v5013_v19 = vld [vmem:[#allocation58_spill] sm:$0xff] }
 0x1f0   : > { %v1101_v17 = vmul.f32 %v3239_v18, %v4980_v30  ;;  %v1102_v51 = vmul.f32 %v3239_v18, %v4981_v25  ;;  %v1340_v62 = vmul.f32 %v3258_v31, %v4997_v36  ;;  %v1341_v49 = vmul.f32 %v3258_v31, %v4998_v4 }
 0x1f1   : > { %v2502_v0 = vmax.f32 %v2470_v60, 0.0  ;;  %v2503_v33 = vmax.f32 %v2471_v52, 0.0  ;;  %v1054_v16 = vadd.f32 %v1023_v55, %v987_v7  ;;  %v1055_v21 = vadd.f32 %v1024_v2, %v988_v26 }
 0x1f2   : > { %v1219_v34 = vrot.slane %v1101_v17, 1  ;;  %v1220_v47 = vrot.slane %v1102_v51, 1  ;;  %v1462_v5 = vrot.slane %v1340_v62, 1  ;;  %v1463_v3 = vrot.slane %v1341_v49, 1 }
 0x1f3   : > { %v2534_v32 = vmin.f32 %v2502_v0, 6.0  ;;  %v2535_v9 = vmin.f32 %v2503_v33, 6.0  ;;  %v1584_v45 = vmul.f32 %v3275_v43, %v3737_v10  ;;  %v5014_v35 = vrot.slane %v5013_v19, 1 }
 0x1f4   : > { %v1221_v39 = vsel %vm1156_vm1, %v1219_v34, %v1220_v47  ;;  %v1585_v22 = vmul.f32 %v3275_v43, %v3743_v8  ;;  %v1818_v27 = vmul.f32 %v3246_v23, %v4980_v30  ;;  %v1464_v60 = vsel %vm1156_vm1, %v1462_v5, %v1463_v3 }
 0x1f5   : > { %v1223_v14 = vsel %vm1156_vm1, %v1220_v47, %v5014_v35  ;;  %v2562_v46 = vpack.c.bf16 %v2535_v9, %v2534_v32  ;;  %v1291_v40 = vadd.f32 %v1221_v39, %v1054_v16  ;;  %v5015_v52 = vrot.slane %v3768_v61, 1 }
 0x1f6   : > { %v1292_v55 = vadd.f32 %v1223_v14, %v1055_v21  ;;  %v1702_v2 = vrot.slane %v1584_v45, 1  ;;  %v1703_v26 = vrot.slane %v1585_v22, 1  ;;  %v1819_v17 = vmul.f32 %v3246_v23, %v4981_v25  ;;  %v5017_v21 = vld [vmem:[#allocation61_spill] sm:$0xff] }
 0x1f7   : > { %v1466_v7 = vsel %vm1156_vm1, %v1463_v3, %v5015_v52  ;;  %v2610_v51 = vsel %vm2593_vm3, %v2562_v46, 0  ;;  %v1535_v62 = vadd.f32 %v1464_v60, %v1291_v40  ;;  %v1936_v33 = vrot.slane %v1818_v27, 2  ;;  %v5018_v46 = vld [vmem:[#allocation67_spill] sm:$0xff] }
 0x1f8   : > { %v1536_v0 = vadd.f32 %v1466_v7, %v1292_v55  ;;  %2866 = vmatpush3.bf16.xpose.msra.mxu1 %v2610_v51  ;;  %v1704_v30 = vsel %vm1156_vm1, %v1702_v2, %v1703_v26  ;;  %v5016_v16 = vrot.slane %v3805_v24, 1  ;;  %v1937_v61 = vrot.slane %v1819_v17, 2 }
 0x1f9   : > { %v1939_v34 = vrot.slane %v5017_v21, 2  ;;  %v1771_v47 = vadd.f32 %v1704_v30, %v1535_v62  ;;  %v2057_v25 = vmul.f32 %v3269_v37, %v4997_v36  ;;  %v2058_v32 = vmul.f32 %v3269_v37, %v4998_v4 }
 0x1fa   : > { %v1706_v49 = vsel %vm1156_vm1, %v1703_v26, %v5016_v16  ;;  %v1938_v9 = vsel %vm1873_vm2, %v1936_v33, %v1937_v61  ;;  %v2059_v24 = vmul.f32 %v3269_v37, %v5005_v54  ;;  %v2301_v45 = vmul.f32 %v4051_v53, %v3737_v10 }
 0x1fb   : > { %v1772_v5 = vadd.f32 %v1706_v49, %v1536_v0  ;;  %v1940_v3 = vsel %vm1873_vm2, %v1937_v61, %v1939_v34  ;;  %v2008_v39 = vadd.f32 %v1938_v9, %v1771_v47  ;;  %v2179_v35 = vrot.slane %v2057_v25, 2  ;;  %v5019_v61 = vld [vmem:[#allocation26_spill] sm:$0xff]  ;;  %v5020_v34 = vld [vmem:[#allocation28_spill] sm:$0xff] }
 0x1fc   : > { %v2180_v14 = vrot.slane %v2058_v32, 2  ;;  %v2182_v22 = vrot.slane %v2059_v24, 2  ;;  %v2302_v27 = vmul.f32 %v4051_v53, %v3743_v8  ;;  %v2303_v40 = vmul.f32 %v4051_v53, %v5018_v46  ;;  %v4454_v53 = vld [vmem:[%s4789_s4] ss:$0 sm:$0xff] }
 0x1fd   : > { %v2009_v19 = vadd.f32 %v1940_v3, %v1772_v5  ;;  %v2419_v55 = vrot.slane %v2301_v45, 2  ;;  %v865_v54 = vmul.f32 %v3232_v15, %v4990_v56  ;;  %v866_v52 = vmul.f32 %v3232_v15, %v4991_v6 }
 0x1fe   : > { %v2181_v60 = vsel %vm1873_vm2, %v2179_v35, %v2180_v14  ;;  %v939_v7 = vmul.f32 %v3271_v38, %v5006_v57  ;;  %v2183_v2 = vsel %vm1873_vm2, %v2180_v14, %v2182_v22  ;;  %v2420_v17 = vrot.slane %v2302_v27, 2 }
 0x1ff   : > { %v2252_v26 = vadd.f32 %v2181_v60, %v2008_v39  ;;  %v2422_v51 = vrot.slane %v2303_v40, 2  ;;  %v2253_v62 = vadd.f32 %v2183_v2, %v2009_v19  ;;  %v903_v0 = vadd.f32 %v4454_v53, %v865_v54 }
 0x200   : > { %v904_v33 = vadd.f32 %v4454_v53, %v866_v52  ;;  %v940_v30 = vmul.f32 %v3271_v38, %v5007_v41  ;;  %v2421_v16 = vsel %vm1873_vm2, %v2419_v55, %v2420_v17  ;;  %v1007_v21 = vmul.f32 %v3277_v44, %v5019_v61 }
 0x201   : > { %v2423_v49 = vsel %vm1873_vm2, %v2420_v17, %v2422_v51  ;;  %v1008_v47 = vmul.f32 %v3277_v44, %v5020_v34  ;;  %v2488_v5 = vadd.f32 %v2421_v16, %v2252_v26  ;;  %v971_v32 = vadd.f32 %v939_v7, %v903_v0  ;;  %v5021_v17 = vld [vmem:[#allocation22_spill] sm:$0xff] }
 0x202   : > { %v2489_v25 = vadd.f32 %v2423_v49, %v2253_v62  ;;  %v972_v9 = vadd.f32 %v940_v30, %v904_v33  ;;  %v1077_v3 = vmul.f32 %v3239_v18, %v4990_v56  ;;  %v1078_v24 = vmul.f32 %v3239_v18, %v4991_v6  ;;  %v5023_v33 = vld [vmem:[#allocation31_spill] sm:$0xff] }
 0x203   : > { %v1316_v45 = vmul.f32 %v3258_v31, %v5006_v57  ;;  %v1317_v39 = vmul.f32 %v3258_v31, %v5007_v41  ;;  %v2520_v19 = vmax.f32 %v2488_v5, 0.0  ;;  %v1038_v14 = vadd.f32 %v1007_v21, %v971_v32  ;;  %v5025_v5 = vld [vmem:[#allocation33_spill] sm:$0xff] }
 0x204   : > { %v2521_v35 = vmax.f32 %v2489_v25, 0.0  ;;  %v1039_v22 = vadd.f32 %v1008_v47, %v972_v9  ;;  %v1179_v27 = vrot.slane %v1077_v3, 1  ;;  %v1180_v40 = vrot.slane %v1078_v24, 1 }
 0x205   : > { %v1422_v55 = vrot.slane %v1316_v45, 1  ;;  %v1423_v60 = vrot.slane %v1317_v39, 1  ;;  %v2552_v54 = vmin.f32 %v2520_v19, 6.0  ;;  %v1560_v7 = vmul.f32 %v3275_v43, %v5019_v61 }
 0x206   : > { %v2553_v52 = vmin.f32 %v2521_v35, 6.0  ;;  %v1561_v2 = vmul.f32 %v3275_v43, %v5020_v34  ;;  %v1181_v26 = vsel %vm1156_vm1, %v1179_v27, %v1180_v40  ;;  %v5022_v51 = vrot.slane %v5021_v17, 1 }
 0x207   : > { %v1424_v0 = vsel %vm1156_vm1, %v1422_v55, %v1423_v60  ;;  %v5024_v30 = vrot.slane %v5023_v33, 1  ;;  %v1275_v21 = vadd.f32 %v1181_v26, %v1038_v14  ;;  %v1562_v25 = vmul.f32 %v3275_v43, %v5025_v5 }
 0x208   : > { %v1183_v62 = vsel %vm1156_vm1, %v1180_v40, %v5022_v51  ;;  %v2571_v49 = vpack.c.bf16 %v2553_v52, %v2552_v54  ;;  %v1662_v32 = vrot.slane %v1560_v7, 1  ;;  %v1663_v9 = vrot.slane %v1561_v2, 1  ;;  %v4508_v51 = vld [vmem:[%s4788_s3 + $0x8] ss:$0 sm:$0xff] }
 0x209   : > { %v1426_v16 = vsel %vm1156_vm1, %v1423_v60, %v5024_v30  ;;  %v1276_v47 = vadd.f32 %v1183_v62, %v1039_v22  ;;  %v1794_v3 = vmul.f32 %v3246_v23, %v4990_v56  ;;  %v1795_v24 = vmul.f32 %v3246_v23, %v4991_v6 }
 0x20a   : > { %2930 = vmatprep.subr.msk.bf16.mxu1 %vm2593_vm3, %v2571_v49  ;;  %v1519_v45 = vadd.f32 %v1424_v0, %v1275_v21  ;;  %v1665_v19 = vrot.slane %v1562_v25, 1  ;;  %v1796_v35 = vmul.f32 %v3246_v23, %v4996_v48  ;;  %v1664_v14 = vsel %vm1156_vm1, %v1662_v32, %v1663_v9 }
 0x20b   : > { %v1520_v39 = vadd.f32 %v1426_v16, %v1276_v47  ;;  %v1896_v22 = vrot.slane %v1794_v3, 2  ;;  %v1897_v27 = vrot.slane %v1795_v24, 2  ;;  %v2033_v40 = vmul.f32 %v3269_v37, %v5006_v57 }
 0x20c   : > { %v1666_v56 = vsel %vm1156_vm1, %v1663_v9, %v1665_v19  ;;  %v1755_v55 = vadd.f32 %v1664_v14, %v1519_v45  ;;  %v1899_v60 = vrot.slane %v1796_v35, 2  ;;  %v2034_v6 = vmul.f32 %v3269_v37, %v5007_v41 }
 0x20d   : > { %v1756_v54 = vadd.f32 %v1666_v56, %v1520_v39  ;;  %v1898_v52 = vsel %vm1873_vm2, %v1896_v22, %v1897_v27  ;;  %v2035_v48 = vmul.f32 %v3269_v37, %v5012_v63  ;;  %v2139_v7 = vrot.slane %v2033_v40, 2 }
 0x20e   : > { %v1900_v2 = vsel %vm1873_vm2, %v1897_v27, %v1899_v60  ;;  %v1992_v26 = vadd.f32 %v1898_v52, %v1755_v55  ;;  %v2140_v17 = vrot.slane %v2034_v6, 2  ;;  %v2277_v62 = vmul.f32 %v4508_v51, %v5019_v61 }
 0x20f   : > { %v1993_v0 = vadd.f32 %v1900_v2, %v1756_v54  ;;  %v2142_v33 = vrot.slane %v2035_v48, 2  ;;  %v2278_v30 = vmul.f32 %v4508_v51, %v5020_v34  ;;  %v2279_v16 = vmul.f32 %v4508_v51, %v5025_v5 }
 0x210   : > { %v2141_v49 = vsel %vm1873_vm2, %v2139_v7, %v2140_v17  ;;  %v2379_v21 = vrot.slane %v2277_v62, 2  ;;  %v1104_v47 = vmul.f32 %v3239_v18, %v4997_v36  ;;  %v1343_v25 = vmul.f32 %v3258_v31, %v3737_v10 }
 0x211   : > { %v2143_v32 = vsel %vm1873_vm2, %v2140_v17, %v2142_v33  ;;  %v2236_v9 = vadd.f32 %v2141_v49, %v1992_v26  ;;  %v2380_v3 = vrot.slane %v2278_v30, 2  ;;  %v2382_v24 = vrot.slane %v2279_v16, 2  ;;  %v5030_v26 = vld [vmem:[#allocation64_spill] sm:$0xff] }
 0x212   : > { %v2237_v45 = vadd.f32 %v2143_v32, %v1993_v0  ;;  %v1224_v39 = vrot.slane %v1104_v47, 1  ;;  %v1467_v19 = vrot.slane %v1343_v25, 1  ;;  %v5026_v35 = vrot.slane %v3829_v13, 1 }
 0x213   : > { %v5027_v14 = vrot.slane %v3898_v11, 1  ;;  %v2381_v27 = vsel %vm1873_vm2, %v2379_v21, %v2380_v3  ;;  %v2383_v40 = vsel %vm1873_vm2, %v2380_v3, %v2382_v24  ;;  %v1821_v56 = vmul.f32 %v3246_v23, %v4997_v36  ;;  %v5031_v24 = vld [vmem:[#allocation65_spill] sm:$0xff] }
 0x214   : > { %v1822_v55 = vmul.f32 %v3246_v23, %v4998_v4  ;;  %v2472_v60 = vadd.f32 %v2381_v27, %v2236_v9  ;;  %v2473_v6 = vadd.f32 %v2383_v40, %v2237_v45  ;;  %v5028_v54 = vrot.slane %v3757_v42, 1 }
 0x215   : > { %v1709_v22 = vsel %vm1156_vm1, %v5027_v14, %v5026_v35  ;;  %v5029_v11 = vrot.slane %v3819_v12, 1  ;;  %v1941_v7 = vrot.slane %v1821_v56, 2  ;;  %v1944_v17 = vrot.slane %v5030_v26, 2  ;;  %v5035_v26 = vld [vmem:[#allocation32_spill] sm:$0xff] }
 0x216   : > { %v1226_v13 = vsel %vm1156_vm1, %v1224_v39, %v5028_v54  ;;  %v1942_v2 = vrot.slane %v1822_v55, 2  ;;  %v2504_v36 = vmax.f32 %v2472_v60, 0.0  ;;  %v2505_v62 = vmax.f32 %v2473_v6, 0.0 }
 0x217   : > { %v1469_v52 = vsel %vm1156_vm1, %v1467_v19, %v5029_v11  ;;  %v1293_v48 = vadd.f32 %v1226_v13, %v3902_v50  ;;  %v2060_v4 = vmul.f32 %v3269_v37, %v3737_v10  ;;  %v2061_v42 = vmul.f32 %v3269_v37, %v3743_v8  ;;  %v5032_v11 = vld [vmem:[#allocation71_spill] sm:$0xff] }
 0x218   : > { %v1943_v33 = vsel %vm1873_vm2, %v1941_v7, %v1942_v2  ;;  %v1945_v12 = vsel %vm1873_vm2, %v1942_v2, %v1944_v17  ;;  %v2062_v50 = vmul.f32 %v3269_v37, %v5018_v46  ;;  %v2536_v30 = vmin.f32 %v2504_v36, 6.0  ;;  %v5034_v7 = vld [vmem:[#allocation38_spill] sm:$0xff] }
 0x219   : > { %v1537_v0 = vadd.f32 %v1469_v52, %v1293_v48  ;;  %v2537_v16 = vmin.f32 %v2505_v62, 6.0  ;;  %v2011_v49 = vadd.f32 %v1945_v12, %v3863_v28  ;;  %v2184_v21 = vrot.slane %v2060_v4, 2 }
 0x21a   : > { %v2185_v25 = vrot.slane %v2061_v42, 2  ;;  %v2187_v32 = vrot.slane %v2062_v50, 2  ;;  %v2304_v9 = vmul.f32 %v4508_v51, %v3876_v1  ;;  %v2305_v45 = vmul.f32 %v4508_v51, %v5031_v24 }
 0x21b   : > { %v1773_v47 = vadd.f32 %v1709_v22, %v1537_v0  ;;  %v2563_v3 = vpack.c.bf16 %v2537_v16, %v2536_v30  ;;  %v867_v39 = vmul.f32 %v3232_v15, %v5006_v57  ;;  %v868_v46 = vmul.f32 %v3232_v15, %v5007_v41 }
 0x21c   : > { %v2186_v28 = vsel %vm1873_vm2, %v2184_v21, %v2185_v25  ;;  %v2188_v35 = vsel %vm1873_vm2, %v2185_v25, %v2187_v32  ;;  %v2424_v14 = vrot.slane %v2304_v9, 2  ;;  %v2425_v40 = vrot.slane %v2305_v45, 2 }
 0x21d   : > { %v2010_v19 = vadd.f32 %v1943_v33, %v1773_v47  ;;  %v2613_v22 = vsel %vm2593_vm3, %v2563_v3, 0  ;;  %v2255_v27 = vadd.f32 %v2188_v35, %v2011_v49  ;;  %v905_v56 = vadd.f32 %v4454_v53, %v867_v39 }
 0x21e   : > { %2868 = vmatpush3.bf16.xpose.msra.mxu1 %v2613_v22  ;;  %v906_v60 = vadd.f32 %v4454_v53, %v868_v46  ;;  %v941_v6 = vmul.f32 %v3271_v38, %v5019_v61  ;;  %v942_v54 = vmul.f32 %v3271_v38, %v5020_v34  ;;  %v2426_v13 = vsel %vm1873_vm2, %v2424_v14, %v2425_v40 }
 0x21f   : > { %v2254_v55 = vadd.f32 %v2186_v28, %v2010_v19  ;;  %v5033_v52 = vrot.slane %v5032_v11, 2  ;;  %v1009_v2 = vmul.f32 %v3277_v44, %v5034_v7  ;;  %v1010_v17 = vmul.f32 %v3277_v44, %v5035_v26  ;;  %v5036_v28 = vld [vmem:[#allocation30_spill] sm:$0xff] }
 0x220   : > { %v973_v4 = vadd.f32 %v941_v6, %v905_v56  ;;  %v974_v42 = vadd.f32 %v942_v54, %v906_v60  ;;  %v1080_v0 = vmul.f32 %v3239_v18, %v5006_v57  ;;  %v1081_v33 = vmul.f32 %v3239_v18, %v5007_v41  ;;  %v5040_v54 = vld [vmem:[#allocation35_spill] sm:$0xff] }
 0x221   : > { %v2428_v48 = vsel %vm1873_vm2, %v2425_v40, %v5033_v52  ;;  %v2490_v36 = vadd.f32 %v2426_v13, %v2254_v55  ;;  %v1319_v12 = vmul.f32 %v3258_v31, %v5019_v61  ;;  %v1320_v50 = vmul.f32 %v3258_v31, %v5020_v34 }
 0x222   : > { %v2491_v62 = vadd.f32 %v2428_v48, %v2255_v27  ;;  %v1040_v49 = vadd.f32 %v1009_v2, %v973_v4  ;;  %v1041_v21 = vadd.f32 %v1010_v17, %v974_v42  ;;  %v1184_v47 = vrot.slane %v1080_v0, 1  ;;  %v5038_v27 = vld [vmem:[#allocation37_spill] sm:$0xff] }
 0x223   : > { %v2522_v30 = vmax.f32 %v2490_v36, 0.0  ;;  %v1185_v25 = vrot.slane %v1081_v33, 1  ;;  %v1427_v32 = vrot.slane %v1319_v12, 1  ;;  %v1428_v9 = vrot.slane %v1320_v50, 1 }
 0x224   : > { %v2523_v16 = vmax.f32 %v2491_v62, 0.0  ;;  %v1563_v39 = vmul.f32 %v3275_v43, %v5034_v7  ;;  %v1564_v46 = vmul.f32 %v3275_v43, %v5035_v26  ;;  %v5037_v35 = vrot.slane %v5036_v28, 1 }
 0x225   : > { %v2554_v3 = vmin.f32 %v2522_v30, 6.0  ;;  %v1186_v19 = vsel %vm1156_vm1, %v1184_v47, %v1185_v25  ;;  %v1429_v22 = vsel %vm1156_vm1, %v1427_v32, %v1428_v9  ;;  %v5039_v40 = vrot.slane %v5038_v27, 1 }
 0x226   : > { %v2555_v45 = vmin.f32 %v2523_v16, 6.0  ;;  %v1188_v14 = vsel %vm1156_vm1, %v1185_v25, %v5037_v35  ;;  %v1277_v60 = vadd.f32 %v1186_v19, %v1040_v49  ;;  %v1565_v13 = vmul.f32 %v3275_v43, %v5040_v54  ;;  %v5041_v35 = vld [vmem:[#allocation6_spill] sm:$0xff] }
 0x227   : > { %v1431_v56 = vsel %vm1156_vm1, %v1428_v9, %v5039_v40  ;;  %v1278_v6 = vadd.f32 %v1188_v14, %v1041_v21  ;;  %v1667_v11 = vrot.slane %v1563_v39, 1  ;;  %v1668_v52 = vrot.slane %v1564_v46, 1 }
 0x228   : > { %v2572_v55 = vpack.c.bf16 %v2555_v45, %v2554_v3  ;;  %v1797_v48 = vmul.f32 %v3246_v23, %v5006_v57  ;;  %v1798_v2 = vmul.f32 %v3246_v23, %v5007_v41  ;;  %v1521_v17 = vadd.f32 %v1429_v22, %v1277_v60 }
 0x229   : > { %v1522_v36 = vadd.f32 %v1431_v56, %v1278_v6  ;;  %v1670_v62 = vrot.slane %v1565_v13, 1  ;;  %v1799_v4 = vmul.f32 %v3246_v23, %v5012_v63  ;;  %v1669_v42 = vsel %vm1156_vm1, %v1667_v11, %v1668_v52  ;;  %v5042_v13 = vld [vmem:[#allocation69_spill] sm:$0xff] }
 0x22a   : > { %2931 = vmatprep.subr.msk.bf16.mxu1 %vm2593_vm3, %v2572_v55  ;;  %v1901_v0 = vrot.slane %v1797_v48, 2  ;;  %v1902_v33 = vrot.slane %v1798_v2, 2  ;;  %v2036_v12 = vmul.f32 %v3269_v37, %v5019_v61  ;;  %v1757_v50 = vadd.f32 %v1669_v42, %v1521_v17 }
 0x22b   : > { %v1671_v57 = vsel %vm1156_vm1, %v1668_v52, %v1670_v62  ;;  %v1904_v30 = vrot.slane %v1799_v4, 2  ;;  %v2037_v41 = vmul.f32 %v3269_v37, %v5020_v34  ;;  %v2038_v63 = vmul.f32 %v3269_v37, %v5025_v5 }
 0x22c   : > { %v1758_v16 = vadd.f32 %v1671_v57, %v1522_v36  ;;  %v1903_v49 = vsel %vm1873_vm2, %v1901_v0, %v1902_v33  ;;  %v2144_v21 = vrot.slane %v2036_v12, 2  ;;  %v2280_v9 = vmul.f32 %v4508_v51, %v5034_v7  ;;  %v5045_v0 = vld [vmem:[#allocation66_spill] sm:$0xff] }
 0x22d   : > { %v1905_v47 = vsel %vm1873_vm2, %v1902_v33, %v1904_v30  ;;  %v1994_v25 = vadd.f32 %v1903_v49, %v1757_v50  ;;  %v2145_v32 = vrot.slane %v2037_v41, 2  ;;  %v2147_v45 = vrot.slane %v2038_v63, 2  ;;  %v5047_v41 = vld [vmem:[#allocation68_spill] sm:$0xff] }
 0x22e   : > { %v1995_v3 = vadd.f32 %v1905_v47, %v1758_v16  ;;  %v2281_v39 = vmul.f32 %v4508_v51, %v5035_v26  ;;  %v2282_v46 = vmul.f32 %v4508_v51, %v5040_v54  ;;  %v2384_v28 = vrot.slane %v2280_v9, 2 }
 0x22f   : > { %v2146_v19 = vsel %vm1873_vm2, %v2144_v21, %v2145_v32  ;;  %v1058_v14 = vadd.f32 %v5041_v35, %v3900_v59  ;;  %v1107_v22 = vmul.f32 %v3239_v18, %v3737_v10  ;;  %v2148_v27 = vsel %vm1873_vm2, %v2145_v32, %v2147_v45  ;;  %v5048_v21 = vld [vmem:[#allocation72_spill] sm:$0xff] }
 0x230   : > { %v2238_v40 = vadd.f32 %v2146_v19, %v1994_v25  ;;  %v2385_v56 = vrot.slane %v2281_v39, 2  ;;  %v2387_v55 = vrot.slane %v2282_v46, 2  ;;  %v2239_v60 = vadd.f32 %v2148_v27, %v1995_v3 }
 0x231   : > { %v1229_v6 = vrot.slane %v1107_v22, 1  ;;  %v5043_v11 = vrot.slane %v5042_v13, 1  ;;  %v5044_v52 = vrot.slane %v3894_v20, 1  ;;  %v1590_v2 = vmul.f32 0.0, %v3275_v43 }
 0x232   : > { %v2386_v59 = vsel %vm1873_vm2, %v2384_v28, %v2385_v56  ;;  %v2388_v17 = vsel %vm1873_vm2, %v2385_v56, %v2387_v55  ;;  %v1824_v36 = vmul.f32 %v3246_v23, %v3737_v10  ;;  %v1825_v62 = vmul.f32 %v3246_v23, %v3743_v8  ;;  %v5049_v55 = vld [vmem:[#allocation70_spill] sm:$0xff] }
 0x233   : > { %v1474_v48 = vsel %vm1156_vm1, %v5044_v52, %v5043_v11  ;;  %v2474_v4 = vadd.f32 %v2386_v59, %v2238_v40  ;;  %v2475_v42 = vadd.f32 %v2388_v17, %v2239_v60  ;;  %v5046_v33 = vrot.slane %v5045_v0, 1  ;;  %v5051_v59 = vld [vmem:[#allocation41_spill] sm:$0xff] }
 0x234   : > { %v1712_v12 = vrot.slane %v1590_v2, 1  ;;  %v1946_v50 = vrot.slane %v1824_v36, 2  ;;  %v1947_v30 = vrot.slane %v1825_v62, 2  ;;  %v1949_v16 = vrot.slane %v5047_v41, 2 }
 0x235   : > { %v1231_v20 = vsel %vm1156_vm1, %v1229_v6, %v5046_v33  ;;  %v2506_v49 = vmax.f32 %v2474_v4, 0.0  ;;  %v2507_v63 = vmax.f32 %v2475_v42, 0.0  ;;  %v2063_v10 = vmul.f32 %v3269_v37, %v3876_v1 }
 0x236   : > { %v1295_v57 = vadd.f32 %v1231_v20, %v1058_v14  ;;  %v1776_v47 = vadd.f32 %v1712_v12, %v5048_v21  ;;  %v1948_v25 = vsel %vm1873_vm2, %v1946_v50, %v1947_v30  ;;  %v1950_v32 = vsel %vm1873_vm2, %v1947_v30, %v1949_v16 }
 0x237   : > { %v2064_v9 = vmul.f32 %v3269_v37, %v5031_v24  ;;  %v2538_v3 = vmin.f32 %v2506_v49, 6.0  ;;  %v2539_v45 = vmin.f32 %v2507_v63, 6.0  ;;  %v2189_v46 = vrot.slane %v2063_v10, 2 }
 0x238   : > { %v1539_v8 = vadd.f32 %v1474_v48, %v1295_v57  ;;  %v2013_v39 = vadd.f32 %v1950_v32, %v1776_v47  ;;  %v2307_v35 = vmul.f32 0.0, %v4508_v51  ;;  %v869_v14 = vmul.f32 %v3232_v15, %v5019_v61  ;;  %v5052_v47 = vld [vmem:[#allocation36_spill] sm:$0xff] }
 0x239   : > { %v2190_v28 = vrot.slane %v2064_v9, 2  ;;  %v2564_v1 = vpack.c.bf16 %v2539_v45, %v2538_v3  ;;  %v870_v22 = vmul.f32 %v3232_v15, %v5020_v34  ;;  %v943_v27 = vmul.f32 %v3271_v38, %v5034_v7  ;;  %v5054_v45 = vld [vmem:[#allocation39_spill] sm:$0xff] }
 0x23a   : > { %v1775_v19 = vadd.f32 %v1712_v12, %v1539_v8  ;;  %v944_v24 = vmul.f32 %v3271_v38, %v5035_v26  ;;  %v5050_v60 = vrot.slane %v5049_v55, 2  ;;  %v2429_v13 = vrot.slane %v2307_v35, 2 }
 0x23b   : > { %v2191_v56 = vsel %vm1873_vm2, %v2189_v46, %v2190_v28  ;;  %v2616_v11 = vsel %vm2593_vm3, %v2564_v1, 0  ;;  %v907_v48 = vadd.f32 %v4454_v53, %v869_v14  ;;  %v908_v15 = vadd.f32 %v4454_v53, %v870_v22 }
 0x23c   : > { %v2012_v40 = vadd.f32 %v1948_v25, %v1775_v19  ;;  %v2193_v6 = vsel %vm1873_vm2, %v2190_v28, %v5050_v60  ;;  %2870 = vmatpush3.bf16.xpose.msra.mxu1 %v2616_v11  ;;  %v1011_v38 = vmul.f32 %v3277_v44, %v3559_v58  ;;  %v1012_v17 = vmul.f32 %v3277_v44, %v5051_v59  ;;  %v5056_v19 = vld [vmem:[#allocation40_spill] sm:$0xff] }
 0x23d   : > { %v2257_v52 = vadd.f32 %v2193_v6, %v2013_v39  ;;  %v1083_v36 = vmul.f32 %v3239_v18, %v5019_v61  ;;  %v975_v4 = vadd.f32 %v943_v27, %v907_v48  ;;  %v976_v42 = vadd.f32 %v944_v24, %v908_v15 }
 0x23e   : > { %v2256_v2 = vadd.f32 %v2191_v56, %v2012_v40  ;;  %v1084_v0 = vmul.f32 %v3239_v18, %v5020_v34  ;;  %v1322_v53 = vmul.f32 %v3258_v31, %v5034_v7  ;;  %v1323_v12 = vmul.f32 %v3258_v31, %v5035_v26 }
 0x23f   : > { %v2493_v62 = vadd.f32 %v2429_v13, %v2257_v52  ;;  %v1189_v20 = vrot.slane %v1083_v36, 1  ;;  %v1042_v50 = vadd.f32 %v1011_v38, %v975_v4  ;;  %v1043_v44 = vadd.f32 %v1012_v17, %v976_v42 }
 0x240   : > { %v2492_v33 = vadd.f32 %v2429_v13, %v2256_v2  ;;  %v1190_v30 = vrot.slane %v1084_v0, 1  ;;  %v1432_v16 = vrot.slane %v1322_v53, 1  ;;  %v1433_v49 = vrot.slane %v1323_v12, 1 }
 0x241   : > { %v2525_v57 = vmax.f32 %v2493_v62, 0.0  ;;  %v1566_v63 = vmul.f32 %v3275_v43, %v3559_v58  ;;  %v5053_v10 = vrot.slane %v5052_v47, 1  ;;  %v1567_v31 = vmul.f32 %v3275_v43, %v5051_v59 }
 0x242   : > { %v2524_v41 = vmax.f32 %v2492_v33, 0.0  ;;  %v1191_v18 = vsel %vm1156_vm1, %v1189_v20, %v1190_v30  ;;  %v1434_v3 = vsel %vm1156_vm1, %v1432_v16, %v1433_v49  ;;  %v5055_v39 = vrot.slane %v5054_v45, 1 }
 0x243   : > { %v2557_v21 = vmin.f32 %v2525_v57, 6.0  ;;  %v1193_v8 = vsel %vm1156_vm1, %v1190_v30, %v5053_v10  ;;  %v1279_v32 = vadd.f32 %v1191_v18, %v1042_v50  ;;  %v1568_v28 = vmul.f32 %v3275_v43, %v5056_v19  ;;  %v2577_v50 = vld [vmem:[%s4791_s6 + $0x8] sm:$0xff]  ;;  %v2688_v10 = vld [vmem:[%s323_s17] sm:$0xff] }
 0x244   : > { %v2556_v25 = vmin.f32 %v2524_v41, 6.0  ;;  %v1280_v9 = vadd.f32 %v1193_v8, %v1043_v44  ;;  %v1436_v46 = vsel %vm1156_vm1, %v1433_v49, %v5055_v39  ;;  %v1672_v35 = vrot.slane %v1566_v63, 1 }
 0x245   : > { %v1673_v14 = vrot.slane %v1567_v31, 1  ;;  %v1523_v22 = vadd.f32 %v1434_v3, %v1279_v32  ;;  %v1800_v24 = vmul.f32 %v3246_v23, %v5019_v61  ;;  %v1675_v56 = vrot.slane %v1568_v28, 1  ;;  %v2690_v3 = vld [vmem:[%s323_s17 + $0x10] sm:$0xff] }
 0x246   : > { %v2573_v1 = vpack.c.bf16 %v2557_v21, %v2556_v25  ;;  %v1524_v27 = vadd.f32 %v1436_v46, %v1280_v9  ;;  %v1801_v55 = vmul.f32 %v3246_v23, %v5020_v34  ;;  %v1802_v60 = vmul.f32 %v3246_v23, %v5025_v5  ;;  %v2689_v25 = vld [vmem:[%s323_s17 + $0x8] sm:$0xff] }
 0x247   : > { %v1674_v40 = vsel %vm1156_vm1, %v1672_v35, %v1673_v14  ;;  %v1906_v6 = vrot.slane %v1800_v24, 2  ;;  %v2039_v13 = vmul.f32 %v3269_v37, %v5034_v7  ;;  %v2040_v11 = vmul.f32 %v3269_v37, %v5035_v26 }
 0x248   : > { %2932 = vmatprep.subr.msk.bf16.mxu1 %vm2593_vm3, %v2573_v1  ;;  %v1759_v43 = vadd.f32 %v1674_v40, %v1523_v22  ;;  %v1676_v61 = vsel %vm1156_vm1, %v1673_v14, %v1675_v56  ;;  %v1907_v52 = vrot.slane %v1801_v55, 2  ;;  %v1909_v48 = vrot.slane %v1802_v60, 2 }
 0x249   : > { %v2041_v34 = vmul.f32 %v3269_v37, %v5040_v54  ;;  %v1760_v15 = vadd.f32 %v1676_v61, %v1524_v27  ;;  %v2149_v2 = vrot.slane %v2039_v13, 2  ;;  %v2150_v23 = vrot.slane %v2040_v11, 2  ;;  %v2576_v54 = vld [vmem:[%s4791_s6] sm:$0xff] }
 0x24a   : > { %v2283_v5 = vmul.f32 %v4508_v51, %v3559_v58  ;;  %v1908_v38 = vsel %vm1873_vm2, %v1906_v6, %v1907_v52  ;;  %v1910_v7 = vsel %vm1873_vm2, %v1907_v52, %v1909_v48  ;;  %v2284_v26 = vmul.f32 %v4508_v51, %v5051_v59 }
 0x24b   : > { %v2152_v17 = vrot.slane %v2041_v34, 2  ;;  %v1996_v36 = vadd.f32 %v1908_v38, %v1759_v43  ;;  %v1997_v62 = vadd.f32 %v1910_v7, %v1760_v15  ;;  %v2151_v4 = vsel %vm1873_vm2, %v2149_v2, %v2150_v23 }
 0x24c   : > { %v2285_v37 = vmul.f32 %v4508_v51, %v5056_v19  ;;  %v2389_v42 = vrot.slane %v2283_v5, 2  ;;  %v2390_v0 = vrot.slane %v2284_v26, 2  ;;  %v3047_v12 = vmov 0   ;;  %v2691_v19 = vld [vmem:[%s323_s17 + $0x18] sm:$0xff] }
 0x24d   : > { %v2153_v58 = vsel %vm1873_vm2, %v2150_v23, %v2152_v17  ;;  %v2240_v33 = vadd.f32 %v2151_v4, %v1996_v36  ;;  %2976 = vset.pattern.permute.xlu0 %v3047_v12 }
 0x24e   : > { %v2241_v20 = vadd.f32 %v2153_v58, %v1997_v62  ;;  %v2392_v53 = vrot.slane %v2285_v37, 2  ;;  %v2391_v59 = vsel %vm1873_vm2, %v2389_v42, %v2390_v0  ;;  %2580 = vperm.xlu0 %2976, %v2576_v54  }
 0x24f   : > { %v2476_v57 = vadd.f32 %v2391_v59, %v2240_v33 }
 0x250   : > { %v2393_v51 = vsel %vm1873_vm2, %v2390_v0, %v2392_v53 }
 0x251   : > { %v2477_v44 = vadd.f32 %v2393_v51, %v2241_v20  ;;  %v2508_v30 = vmax.f32 %v2476_v57, 0.0 }
 0x252   : > { %2585 = vperm.xlu0 %2976, %v2577_v50  }
 0x253   : > { %v2509_v41 = vmax.f32 %v2477_v44, 0.0  ;;  %v2540_v16 = vmin.f32 %v2508_v30, 6.0 }
 0x255   : > { %v2541_v49 = vmin.f32 %v2509_v41, 6.0 }
 0x257   : > { %v2565_v63 = vpack.c.bf16 %v2541_v49, %v2540_v16 }
 0x259   : > { %v2619_v21 = vsel %vm2593_vm3, %v2565_v63, 0 }
 0x25a   : > { %2872 = vmatpush3.bf16.xpose.msra.mxu1 %v2619_v21 }
 0x261   : > { %2874 = vmatmul.mubr.msk.bf16.vlgmr.msra.gmra.mrb[0].mxu1 %vm2593_vm3, %v4304_v29 }
 0x2cd   : > { %v2581_v18 = vpop.permute.xlu0 %2580 }
 0x2d1   : > { %v2586_v32 = vpop.permute.xlu0 %2585 }
 0x334   : > { %v2679_v47 = vpop.f32.mrb[0].mxu1 }
 0x335   : > { %v2680_v8 = vadd.f32 %v2679_v47, %v2581_v18  ;;  %v2681_v31 = vpop.f32.mrb[1].mxu1 }
 0x336   : > { %v2682_v9 = vadd.f32 %v2681_v31, %v2581_v18  ;;  %v2683_v29 = vpop.f32.mrb[2].mxu1 }
 0x337   : > { %v2692_v45 = vadd.f32 %v2688_v10, %v2680_v8  ;;  %v2684_v39 = vadd.f32 %v2683_v29, %v2586_v32  ;;  %v2685_v46 = vpop.f32.mrb[3].mxu1 }
 0x338   : > { %v2693_v28 = vadd.f32 %v2689_v25, %v2682_v9  ;;  %v2686_v35 = vadd.f32 %v2685_v46, %v2586_v32 }
 0x339   : > { %2696 = vst [vmem:[%s313_s20] sm:$0xff] %v2692_v45  ;;  %v2694_v14 = vadd.f32 %v2690_v3, %v2684_v39 }
 0x33a   : > { %2697 = vst [vmem:[%s313_s20 + $0x8] sm:$0xff] %v2693_v28  ;;  %v2695_v1 = vadd.f32 %v2691_v19, %v2686_v35 }
 0x33b   : > { %2698 = vst [vmem:[%s313_s20 + $0x10] sm:$0xff] %v2694_v14 }
 0x33c   : > { %2699 = vst [vmem:[%s313_s20 + $0x18] sm:$0xff] %v2695_v1 }
 0x33d   : > { %2996 = shalt.err (!%p2993_p3)
}
 0x33e   : > { %s2997_s10 = scalar_lea.hbm %s4740_s24, 512  ;;  %s3001_s20 = scalar_lea.hbm %s4793_s8, 1024 }
 0x33f   : > { %p2998_p4 = scmp.ne.s32.totalorder %s4740_s24, %s2997_s10  ;;  %p3002_p9 = scmp.lt.u32.totalorder %s4740_s24, %s4793_s8 }
 0x340   : > { %p3003_p10 = scmp.lt.u32.totalorder %s3001_s20, %s2997_s10  ;;  %p3005_p12 = scmp.lt.u32.totalorder %s2997_s10, %s4740_s24 }
 0x341   : > { %p2999_p7 = pnand %p2998_p4, %p3134_p5 }
 0x342   : > { %p3004_p11 = por %p3003_p10, %p3002_p9 }
 0x343   : > { %p3000_p8 = pneg %p2999_p7 }
 0x344   : > { %p3006_p13 = por %p3005_p12, %p3004_p11 }
 0x346   : > { %p3007_p0 = pnand %p3006_p13, %p3000_p8 }
 0x348   : > { %3010 = shalt.err (!%p3007_p0)
}
 0x349   : > { %s3049_s23 = smov 256   ;;  %s3050_s25 = smov 16  }
 0x34a   : > { %2934 = dma.vmem_to_hbm [thread:$0]  (%p3134_p5), %s4735_s21, 512, %s4740_s24, %s4744_s9, %s3049_s23, %s3049_s23, %s3050_s25  }
 0x34b PF: > { %p2940_p1 = scmp.ge.s32.totalorder %s3045_s30, 2  ;;  %s2729_s26 = sand.u32 1, %s3033_s27  }
 0x34c   : > { %s2730_s12 = scalar_lea.sflag [#allocation3], %s2729_s26 }
 0x34d   : > { %p2937_p2 = pnand %p2940_p1, %p3138_p6 }
 0x34f   : > { %3028 = dma.done.wait (!%p2937_p2), %s2730_s12, 512  }
 0x350   : > { %3030 = vsyncadd (!%p2937_p2), %s2730_s12, 4294966784  ;;  %p18_p3 = scmp.ge.s32.totalorder %s3121_s11, 4   ;;  %s5057_s27 = smov %s3037_s28 }
 0x351   : > { %s5058_s28 = smov %s3041_s29  ;;  %s5059_s29 = smov %s3132_s14 }
 0x352   : > { %s5060_s30 = smov %s3121_s11  ;;  %20 = sbr.rel (!%p18_p3) target bundleno = 3 (0x3), region = 90 }
 0x359   :  { %2735 = vsyncpa [#allocation3], 1 }
 0x35a   :  { %2737 = vsyncpa [#allocation3 + $0x1], 1 }

</bundles_post_ra>
